<compile_context>
chip_gen: v7x
topology: tpu7x:2x2x1
jax: 0.10.0
libtpu: 0.0.40
codegen_flags: <defaults>
</compile_context>

<pallas_src>
import math

import jax
import jax.numpy as jnp
from jax import lax
from jax.experimental import pallas as pl
from jax.experimental.pallas import tpu as pltpu

_BN_EPS = 1e-5
_INV_SQRT2 = 0.7071067811865476
_RES_UNROLL_MAX = 4


def _gelu(x):
    # Exact erf-based GELU == nn.GELU() default; erf runs on the EUP.
    return 0.5 * x * (1.0 + lax.erf(x * _INV_SQRT2))


def _make_kernel(n_res_blocks, n_mid, batch):
    """Kernel ref order (feature-major activations, batch on the lane axis):
       x (batch, in_dim) f32,
       w_in (hidden, in) bf16, gb_in (hidden, 2) f32  [cols: gamma, beta],
       rw1 (n_res, dim, dim) bf16, rw2 (n_res, dim, dim) bf16,
       rgb (n_res, dim, 4) f32  [cols: g1, b1, g2, b2],
       n_mid * [w (F_out, F_in) bf16, gb (F_out, 2) f32],
       w_out (out, hidden) bf16, b_out (out, 1) f32,
       out (out, batch) f32
    """
    inv_b = 1.0 / float(batch)

    def kernel(*refs):
        x_ref = refs[0]
        w_in, gb_in = refs[1], refs[2]
        rw1, rw2, rgb = refs[3], refs[4], refs[5]
        mid_refs = refs[6:6 + 2 * n_mid]
        w_out, b_out, o_ref = refs[6 + 2 * n_mid:]

        def bn(y, gamma, beta):
            # BatchNorm1d training-mode forward over the lane (batch) axis.
            # Single pass: two independent cross-lane reduces (sum, sum-sq).
            s1 = jnp.sum(y, axis=1, keepdims=True)
            s2 = jnp.sum(y * y, axis=1, keepdims=True)
            mean = s1 * inv_b
            var = jnp.maximum(s2 * inv_b - mean * mean, 0.0)
            scale = lax.rsqrt(var + _BN_EPS) * gamma            # (F, 1)
            return (y - mean) * scale + beta

        def matmul(w_bf16, h):
            # (out, in) @ (in, B) -> (out, B); bf16 operands, f32 accumulation.
            return jnp.dot(w_bf16, h.astype(jnp.bfloat16),
                           preferred_element_type=jnp.float32)

        # stem: Linear -> BN -> GELU.  The input keeps its natural (batch, in)
        # layout; contracting both in_dim axes puts the batch on the lane axis
        # of the result with no HBM-side transpose or padding.  The Linear
        # bias cancels exactly inside the training-mode BN and is dropped.
        x_bf = x_ref[...].astype(jnp.bfloat16)
        h0 = lax.dot_general(w_in[...], x_bf, (((1,), (1,)), ((), ())),
                             preferred_element_type=jnp.float32)
        h = _gelu(bn(h0, gb_in[:, 0:1], gb_in[:, 1:2]))

        # residual blocks: GELU(h + BN(Linear(GELU(BN(Linear(h)))))).
        def res_step(w1, w2, gb, hc):
            y = bn(matmul(w1, hc), gb[:, 0:1], gb[:, 1:2])
            y = bn(matmul(w2, _gelu(y)), gb[:, 2:3], gb[:, 3:4])
            return _gelu(hc + y)

        if n_res_blocks <= _RES_UNROLL_MAX:
            for r in range(n_res_blocks):
                h = res_step(rw1[r], rw2[r], rgb[r], h)
        else:
            # Dynamic first-axis ref indexing keeps code size flat and bounds
            # vreg live ranges for deep stacks.
            h = lax.fori_loop(
                0, n_res_blocks,
                lambda r, hc: res_step(rw1[r], rw2[r], rgb[r], hc), h)

        # mid layers: Linear -> BN -> GELU (pre-BN biases cancel, dropped).
        for j in range(n_mid):
            w, gb = mid_refs[2 * j], mid_refs[2 * j + 1]
            h = _gelu(bn(matmul(w[...], h), gb[:, 0:1], gb[:, 1:2]))

        # head: final Linear with bias; lane axis = batch.
        o_ref[...] = (matmul(w_out[...], h) + b_out[...]).astype(o_ref.dtype)

    return kernel


def init_params(key, layers, n_res_blocks):
    """Kernel-ready parameters mirroring ImprovedDNN._init_weights:
    xavier_uniform Linear weights in PyTorch-native (out, in) layout (pre-cast
    to bf16 for the MXU), zero Linear biases (omitted where they cancel into a
    training-mode BatchNorm), BN gamma=1 / beta=0 packed column-wise."""
    def xavier(k, fan_out, fan_in):
        a = math.sqrt(6.0 / (fan_in + fan_out))
        w = jax.random.uniform(k, (fan_out, fan_in), jnp.float32, -a, a)
        return w.astype(jnp.bfloat16)

    def gb_cols(dim, n_pairs=1):
        cols = []
        for _ in range(n_pairs):
            cols += [jnp.ones((dim, 1), jnp.float32),
                     jnp.zeros((dim, 1), jnp.float32)]
        return jnp.concatenate(cols, axis=1)

    dim = layers[1]
    keys = iter(jax.random.split(key, 2 + 2 * n_res_blocks + len(layers)))

    params = []
    # stem Linear(layers[0], layers[1]) + BN(layers[1])
    params += [xavier(next(keys), layers[1], layers[0]), gb_cols(layers[1])]
    # ResBlocks (all dim == layers[1]); stacked weights + packed gamma/beta.
    rw1 = jnp.stack([xavier(next(keys), dim, dim) for _ in range(n_res_blocks)])
    rw2 = jnp.stack([xavier(next(keys), dim, dim) for _ in range(n_res_blocks)])
    rgb = jnp.tile(gb_cols(dim, 2)[None], (n_res_blocks, 1, 1))
    params += [rw1, rw2, rgb]
    # mid Linear(layers[i], layers[i+1]) + BN, for i in 1 .. len(layers)-3
    for i in range(1, len(layers) - 2):
        params += [xavier(next(keys), layers[i + 1], layers[i]),
                   gb_cols(layers[i + 1])]
    # head Linear(layers[-2], layers[-1]) with bias
    params += [xavier(next(keys), layers[-1], layers[-2]),
               jnp.zeros((layers[-1], 1), jnp.float32)]
    return params


def improved_dnn_forward(x, params, layers, n_res_blocks):
    batch, in_dim = x.shape
    assert in_dim == layers[0]
    n_mid = len(layers) - 3

    kernel = _make_kernel(n_res_blocks, n_mid, batch)
    vmem = pl.BlockSpec(memory_space=pltpu.MemorySpace.VMEM)

    # Per-generation scoped-VMEM budget: operands + output + headroom for the
    # live (F, batch) f32 intermediates, capped below the chip's physical VMEM
    # (128 MiB on v5e/v6e, 64 MiB per TC on v7x) minus compiler headroom.
    lane_b = ((batch + 127) // 128) * 128            # internal lane padding
    operand_bytes = x.size * 4 + sum(int(p.size) * p.dtype.itemsize
                                     for p in params)
    operand_bytes += layers[-1] * lane_b * 4         # output slab
    act_bytes = max(layers[1:]) * lane_b * 4 * 10    # live f32 intermediates
    needed = 2 * operand_bytes + act_bytes
    try:
        vmem_cap = int(getattr(pltpu.get_tpu_info(), "vmem_capacity_bytes", 0))
    except Exception:
        vmem_cap = 0
    if vmem_cap <= 0:
        vmem_cap = 64 * 1024 * 1024                  # conservative (v7x) default
    vmem_limit = int(min(max(needed, 16 * 1024 * 1024),
                         vmem_cap - 12 * 1024 * 1024))

    out_t = pl.pallas_call(
        kernel,
        out_shape=jax.ShapeDtypeStruct((layers[-1], batch), jnp.float32),
        in_specs=[vmem] * (1 + len(params)),
        out_specs=vmem,
        compiler_params=pltpu.CompilerParams(vmem_limit_bytes=vmem_limit),
    )(x.astype(jnp.float32), *params)

    # Back to the PyTorch (batch, out_dim) layout.
    return out_t.T


if __name__ == "__main__":
    layers = [16, 32, 32, 8]   # in_dim=16, hidden=32, hidden=32, out_dim=8
    n_res_blocks = 3
    batch = 8

    key = jax.random.PRNGKey(0)
    kx, kp = jax.random.split(key)
    x = jax.random.normal(kx, (batch, layers[0]), dtype=jnp.float32)
    params = init_params(kp, layers, n_res_blocks)

    out = improved_dnn_forward(x, params, layers, n_res_blocks)
    jax.block_until_ready(out)
    assert out.shape == (batch, layers[-1]) and out.dtype == jnp.float32
    assert bool(jnp.all(jnp.isfinite(out)))
    print("KERNEL_OK")
</pallas_src>

<mosaic_0001>
module attributes {stable_mosaic.version = 11 : i64} {
  func.func @kernel(%arg0: memref<8x16xf32, #tpu.memory_space<vmem>>, %arg1: memref<32x16xbf16, #tpu.memory_space<vmem>>, %arg2: memref<32x2xf32, #tpu.memory_space<vmem>>, %arg3: memref<3x32x32xbf16, #tpu.memory_space<vmem>>, %arg4: memref<3x32x32xbf16, #tpu.memory_space<vmem>>, %arg5: memref<3x32x4xf32, #tpu.memory_space<vmem>>, %arg6: memref<32x32xbf16, #tpu.memory_space<vmem>>, %arg7: memref<32x2xf32, #tpu.memory_space<vmem>>, %arg8: memref<8x32xbf16, #tpu.memory_space<vmem>>, %arg9: memref<8x1xf32, #tpu.memory_space<vmem>>, %arg10: memref<8x8xf32, #tpu.memory_space<vmem>>) attributes {dimension_semantics = [], scalar_prefetch = 0 : i64, scratch_operands = 0 : i64, tpu.core_type = #tpu.core_type<tc>} {
    %c0 = arith.constant 0 : index
    %c0_0 = arith.constant 0 : index
    %0 = vector.load %arg0[%c0, %c0_0] : memref<8x16xf32, #tpu.memory_space<vmem>>, vector<8x16xf32>
    %1 = arith.truncf %0 : vector<8x16xf32> to vector<8x16xbf16>
    %c0_1 = arith.constant 0 : index
    %c0_2 = arith.constant 0 : index
    %2 = vector.load %arg1[%c0_1, %c0_2] : memref<32x16xbf16, #tpu.memory_space<vmem>>, vector<32x16xbf16>
    %cst = arith.constant dense<0.000000e+00> : vector<32x8xf32>
    %3 = tpu.matmul %2, %1, %cst {dimension_numbers = #tpu.dot_dimension_numbers<[1], [1], [0], [0], [0, 0, 1, 0], [], []>} : vector<32x16xbf16>, vector<8x16xbf16>, vector<32x8xf32> -> vector<32x8xf32>
    %c0_3 = arith.constant 0 : index
    %c0_4 = arith.constant 0 : index
    %4 = vector.load %arg2[%c0_3, %c0_4] : memref<32x2xf32, #tpu.memory_space<vmem>>, vector<32x1xf32>
    %c0_5 = arith.constant 0 : index
    %c1 = arith.constant 1 : index
    %5 = vector.load %arg2[%c0_5, %c1] : memref<32x2xf32, #tpu.memory_space<vmem>>, vector<32x1xf32>
    %cst_6 = arith.constant dense<0.000000e+00> : vector<32xf32>
    %6 = vector.multi_reduction <add>, %3, %cst_6 [1] : vector<32x8xf32> to vector<32xf32>
    %7 = vector.shape_cast %6 : vector<32xf32> to vector<32x1xf32>
    %8 = arith.mulf %3, %3 : vector<32x8xf32>
    %cst_7 = arith.constant dense<0.000000e+00> : vector<32xf32>
    %9 = vector.multi_reduction <add>, %8, %cst_7 [1] : vector<32x8xf32> to vector<32xf32>
    %10 = vector.shape_cast %9 : vector<32xf32> to vector<32x1xf32>
    %cst_8 = arith.constant 1.250000e-01 : f32
    %11 = vector.broadcast %cst_8 : f32 to vector<32x1xf32>
    %12 = arith.mulf %7, %11 : vector<32x1xf32>
    %cst_9 = arith.constant 1.250000e-01 : f32
    %13 = vector.broadcast %cst_9 : f32 to vector<32x1xf32>
    %14 = arith.mulf %10, %13 : vector<32x1xf32>
    %15 = arith.mulf %12, %12 : vector<32x1xf32>
    %16 = arith.subf %14, %15 : vector<32x1xf32>
    %cst_10 = arith.constant 0.000000e+00 : f32
    %17 = vector.broadcast %cst_10 : f32 to vector<32x1xf32>
    %18 = arith.maximumf %16, %17 : vector<32x1xf32>
    %cst_11 = arith.constant 9.99999974E-6 : f32
    %19 = vector.broadcast %cst_11 : f32 to vector<32x1xf32>
    %20 = arith.addf %18, %19 : vector<32x1xf32>
    %21 = math.rsqrt %20 : vector<32x1xf32>
    %22 = arith.mulf %21, %4 : vector<32x1xf32>
    %23 = vector.broadcast %12 : vector<32x1xf32> to vector<32x8xf32>
    %24 = arith.subf %3, %23 : vector<32x8xf32>
    %25 = vector.broadcast %22 : vector<32x1xf32> to vector<32x8xf32>
    %26 = arith.mulf %24, %25 : vector<32x8xf32>
    %27 = vector.broadcast %5 : vector<32x1xf32> to vector<32x8xf32>
    %28 = arith.addf %26, %27 : vector<32x8xf32>
    %cst_12 = arith.constant 5.000000e-01 : f32
    %29 = vector.broadcast %cst_12 : f32 to vector<32x8xf32>
    %30 = arith.mulf %29, %28 : vector<32x8xf32>
    %cst_13 = arith.constant 0.707106769 : f32
    %31 = vector.broadcast %cst_13 : f32 to vector<32x8xf32>
    %32 = arith.mulf %28, %31 : vector<32x8xf32>
    %33 = math.erf %32 : vector<32x8xf32>
    %cst_14 = arith.constant 1.000000e+00 : f32
    %34 = vector.broadcast %cst_14 : f32 to vector<32x8xf32>
    %35 = arith.addf %34, %33 : vector<32x8xf32>
    %36 = arith.mulf %30, %35 : vector<32x8xf32>
    %c0_15 = arith.constant 0 : index
    %c0_16 = arith.constant 0 : index
    %c0_17 = arith.constant 0 : index
    %37 = vector.load %arg3[%c0_15, %c0_16, %c0_17] : memref<3x32x32xbf16, #tpu.memory_space<vmem>>, vector<1x32x32xbf16>
    %38 = vector.shape_cast %37 : vector<1x32x32xbf16> to vector<32x32xbf16>
    %c0_18 = arith.constant 0 : index
    %c0_19 = arith.constant 0 : index
    %c0_20 = arith.constant 0 : index
    %39 = vector.load %arg4[%c0_18, %c0_19, %c0_20] : memref<3x32x32xbf16, #tpu.memory_space<vmem>>, vector<1x32x32xbf16>
    %40 = vector.shape_cast %39 : vector<1x32x32xbf16> to vector<32x32xbf16>
    %c0_21 = arith.constant 0 : index
    %c0_22 = arith.constant 0 : index
    %c0_23 = arith.constant 0 : index
    %41 = vector.load %arg5[%c0_21, %c0_22, %c0_23] : memref<3x32x4xf32, #tpu.memory_space<vmem>>, vector<1x32x4xf32>
    %42 = vector.shape_cast %41 : vector<1x32x4xf32> to vector<32x4xf32>
    %43 = arith.truncf %36 : vector<32x8xf32> to vector<32x8xbf16>
    %cst_24 = arith.constant dense<0.000000e+00> : vector<32x8xf32>
    %44 = tpu.matmul %38, %43, %cst_24 {dimension_numbers = #tpu.dot_dimension_numbers<[1], [0], [0], [1], [0, 0, 1, 1], [], []>} : vector<32x32xbf16>, vector<32x8xbf16>, vector<32x8xf32> -> vector<32x8xf32>
    %45 = vector.extract_strided_slice %42 {offsets = [0, 0], sizes = [32, 1], strides = [1, 1]} : vector<32x4xf32> to vector<32x1xf32>
    %46 = vector.extract_strided_slice %42 {offsets = [0, 1], sizes = [32, 1], strides = [1, 1]} : vector<32x4xf32> to vector<32x1xf32>
    %cst_25 = arith.constant dense<0.000000e+00> : vector<32xf32>
    %47 = vector.multi_reduction <add>, %44, %cst_25 [1] : vector<32x8xf32> to vector<32xf32>
    %48 = vector.shape_cast %47 : vector<32xf32> to vector<32x1xf32>
    %49 = arith.mulf %44, %44 : vector<32x8xf32>
    %cst_26 = arith.constant dense<0.000000e+00> : vector<32xf32>
    %50 = vector.multi_reduction <add>, %49, %cst_26 [1] : vector<32x8xf32> to vector<32xf32>
    %51 = vector.shape_cast %50 : vector<32xf32> to vector<32x1xf32>
    %cst_27 = arith.constant 1.250000e-01 : f32
    %52 = vector.broadcast %cst_27 : f32 to vector<32x1xf32>
    %53 = arith.mulf %48, %52 : vector<32x1xf32>
    %cst_28 = arith.constant 1.250000e-01 : f32
    %54 = vector.broadcast %cst_28 : f32 to vector<32x1xf32>
    %55 = arith.mulf %51, %54 : vector<32x1xf32>
    %56 = arith.mulf %53, %53 : vector<32x1xf32>
    %57 = arith.subf %55, %56 : vector<32x1xf32>
    %cst_29 = arith.constant 0.000000e+00 : f32
    %58 = vector.broadcast %cst_29 : f32 to vector<32x1xf32>
    %59 = arith.maximumf %57, %58 : vector<32x1xf32>
    %cst_30 = arith.constant 9.99999974E-6 : f32
    %60 = vector.broadcast %cst_30 : f32 to vector<32x1xf32>
    %61 = arith.addf %59, %60 : vector<32x1xf32>
    %62 = math.rsqrt %61 : vector<32x1xf32>
    %63 = arith.mulf %62, %45 : vector<32x1xf32>
    %64 = vector.broadcast %53 : vector<32x1xf32> to vector<32x8xf32>
    %65 = arith.subf %44, %64 : vector<32x8xf32>
    %66 = vector.broadcast %63 : vector<32x1xf32> to vector<32x8xf32>
    %67 = arith.mulf %65, %66 : vector<32x8xf32>
    %68 = vector.broadcast %46 : vector<32x1xf32> to vector<32x8xf32>
    %69 = arith.addf %67, %68 : vector<32x8xf32>
    %cst_31 = arith.constant 5.000000e-01 : f32
    %70 = vector.broadcast %cst_31 : f32 to vector<32x8xf32>
    %71 = arith.mulf %70, %69 : vector<32x8xf32>
    %cst_32 = arith.constant 0.707106769 : f32
    %72 = vector.broadcast %cst_32 : f32 to vector<32x8xf32>
    %73 = arith.mulf %69, %72 : vector<32x8xf32>
    %74 = math.erf %73 : vector<32x8xf32>
    %cst_33 = arith.constant 1.000000e+00 : f32
    %75 = vector.broadcast %cst_33 : f32 to vector<32x8xf32>
    %76 = arith.addf %75, %74 : vector<32x8xf32>
    %77 = arith.mulf %71, %76 : vector<32x8xf32>
    %78 = arith.truncf %77 : vector<32x8xf32> to vector<32x8xbf16>
    %cst_34 = arith.constant dense<0.000000e+00> : vector<32x8xf32>
    %79 = tpu.matmul %40, %78, %cst_34 {dimension_numbers = #tpu.dot_dimension_numbers<[1], [0], [0], [1], [0, 0, 1, 1], [], []>} : vector<32x32xbf16>, vector<32x8xbf16>, vector<32x8xf32> -> vector<32x8xf32>
    %80 = vector.extract_strided_slice %42 {offsets = [0, 2], sizes = [32, 1], strides = [1, 1]} : vector<32x4xf32> to vector<32x1xf32>
    %81 = vector.extract_strided_slice %42 {offsets = [0, 3], sizes = [32, 1], strides = [1, 1]} : vector<32x4xf32> to vector<32x1xf32>
    %cst_35 = arith.constant dense<0.000000e+00> : vector<32xf32>
    %82 = vector.multi_reduction <add>, %79, %cst_35 [1] : vector<32x8xf32> to vector<32xf32>
    %83 = vector.shape_cast %82 : vector<32xf32> to vector<32x1xf32>
    %84 = arith.mulf %79, %79 : vector<32x8xf32>
    %cst_36 = arith.constant dense<0.000000e+00> : vector<32xf32>
    %85 = vector.multi_reduction <add>, %84, %cst_36 [1] : vector<32x8xf32> to vector<32xf32>
    %86 = vector.shape_cast %85 : vector<32xf32> to vector<32x1xf32>
    %cst_37 = arith.constant 1.250000e-01 : f32
    %87 = vector.broadcast %cst_37 : f32 to vector<32x1xf32>
    %88 = arith.mulf %83, %87 : vector<32x1xf32>
    %cst_38 = arith.constant 1.250000e-01 : f32
    %89 = vector.broadcast %cst_38 : f32 to vector<32x1xf32>
    %90 = arith.mulf %86, %89 : vector<32x1xf32>
    %91 = arith.mulf %88, %88 : vector<32x1xf32>
    %92 = arith.subf %90, %91 : vector<32x1xf32>
    %cst_39 = arith.constant 0.000000e+00 : f32
    %93 = vector.broadcast %cst_39 : f32 to vector<32x1xf32>
    %94 = arith.maximumf %92, %93 : vector<32x1xf32>
    %cst_40 = arith.constant 9.99999974E-6 : f32
    %95 = vector.broadcast %cst_40 : f32 to vector<32x1xf32>
    %96 = arith.addf %94, %95 : vector<32x1xf32>
    %97 = math.rsqrt %96 : vector<32x1xf32>
    %98 = arith.mulf %97, %80 : vector<32x1xf32>
    %99 = vector.broadcast %88 : vector<32x1xf32> to vector<32x8xf32>
    %100 = arith.subf %79, %99 : vector<32x8xf32>
    %101 = vector.broadcast %98 : vector<32x1xf32> to vector<32x8xf32>
    %102 = arith.mulf %100, %101 : vector<32x8xf32>
    %103 = vector.broadcast %81 : vector<32x1xf32> to vector<32x8xf32>
    %104 = arith.addf %102, %103 : vector<32x8xf32>
    %105 = arith.addf %36, %104 : vector<32x8xf32>
    %cst_41 = arith.constant 5.000000e-01 : f32
    %106 = vector.broadcast %cst_41 : f32 to vector<32x8xf32>
    %107 = arith.mulf %106, %105 : vector<32x8xf32>
    %cst_42 = arith.constant 0.707106769 : f32
    %108 = vector.broadcast %cst_42 : f32 to vector<32x8xf32>
    %109 = arith.mulf %105, %108 : vector<32x8xf32>
    %110 = math.erf %109 : vector<32x8xf32>
    %cst_43 = arith.constant 1.000000e+00 : f32
    %111 = vector.broadcast %cst_43 : f32 to vector<32x8xf32>
    %112 = arith.addf %111, %110 : vector<32x8xf32>
    %113 = arith.mulf %107, %112 : vector<32x8xf32>
    %c1_44 = arith.constant 1 : index
    %c0_45 = arith.constant 0 : index
    %c0_46 = arith.constant 0 : index
    %114 = vector.load %arg3[%c1_44, %c0_45, %c0_46] : memref<3x32x32xbf16, #tpu.memory_space<vmem>>, vector<1x32x32xbf16>
    %115 = vector.shape_cast %114 : vector<1x32x32xbf16> to vector<32x32xbf16>
    %c1_47 = arith.constant 1 : index
    %c0_48 = arith.constant 0 : index
    %c0_49 = arith.constant 0 : index
    %116 = vector.load %arg4[%c1_47, %c0_48, %c0_49] : memref<3x32x32xbf16, #tpu.memory_space<vmem>>, vector<1x32x32xbf16>
    %117 = vector.shape_cast %116 : vector<1x32x32xbf16> to vector<32x32xbf16>
    %c1_50 = arith.constant 1 : index
    %c0_51 = arith.constant 0 : index
    %c0_52 = arith.constant 0 : index
    %118 = vector.load %arg5[%c1_50, %c0_51, %c0_52] : memref<3x32x4xf32, #tpu.memory_space<vmem>>, vector<1x32x4xf32>
    %119 = vector.shape_cast %118 : vector<1x32x4xf32> to vector<32x4xf32>
    %120 = arith.truncf %113 : vector<32x8xf32> to vector<32x8xbf16>
    %cst_53 = arith.constant dense<0.000000e+00> : vector<32x8xf32>
    %121 = tpu.matmul %115, %120, %cst_53 {dimension_numbers = #tpu.dot_dimension_numbers<[1], [0], [0], [1], [0, 0, 1, 1], [], []>} : vector<32x32xbf16>, vector<32x8xbf16>, vector<32x8xf32> -> vector<32x8xf32>
    %122 = vector.extract_strided_slice %119 {offsets = [0, 0], sizes = [32, 1], strides = [1, 1]} : vector<32x4xf32> to vector<32x1xf32>
    %123 = vector.extract_strided_slice %119 {offsets = [0, 1], sizes = [32, 1], strides = [1, 1]} : vector<32x4xf32> to vector<32x1xf32>
    %cst_54 = arith.constant dense<0.000000e+00> : vector<32xf32>
    %124 = vector.multi_reduction <add>, %121, %cst_54 [1] : vector<32x8xf32> to vector<32xf32>
    %125 = vector.shape_cast %124 : vector<32xf32> to vector<32x1xf32>
    %126 = arith.mulf %121, %121 : vector<32x8xf32>
    %cst_55 = arith.constant dense<0.000000e+00> : vector<32xf32>
    %127 = vector.multi_reduction <add>, %126, %cst_55 [1] : vector<32x8xf32> to vector<32xf32>
    %128 = vector.shape_cast %127 : vector<32xf32> to vector<32x1xf32>
    %cst_56 = arith.constant 1.250000e-01 : f32
    %129 = vector.broadcast %cst_56 : f32 to vector<32x1xf32>
    %130 = arith.mulf %125, %129 : vector<32x1xf32>
    %cst_57 = arith.constant 1.250000e-01 : f32
    %131 = vector.broadcast %cst_57 : f32 to vector<32x1xf32>
    %132 = arith.mulf %128, %131 : vector<32x1xf32>
    %133 = arith.mulf %130, %130 : vector<32x1xf32>
    %134 = arith.subf %132, %133 : vector<32x1xf32>
    %cst_58 = arith.constant 0.000000e+00 : f32
    %135 = vector.broadcast %cst_58 : f32 to vector<32x1xf32>
    %136 = arith.maximumf %134, %135 : vector<32x1xf32>
    %cst_59 = arith.constant 9.99999974E-6 : f32
    %137 = vector.broadcast %cst_59 : f32 to vector<32x1xf32>
    %138 = arith.addf %136, %137 : vector<32x1xf32>
    %139 = math.rsqrt %138 : vector<32x1xf32>
    %140 = arith.mulf %139, %122 : vector<32x1xf32>
    %141 = vector.broadcast %130 : vector<32x1xf32> to vector<32x8xf32>
    %142 = arith.subf %121, %141 : vector<32x8xf32>
    %143 = vector.broadcast %140 : vector<32x1xf32> to vector<32x8xf32>
    %144 = arith.mulf %142, %143 : vector<32x8xf32>
    %145 = vector.broadcast %123 : vector<32x1xf32> to vector<32x8xf32>
    %146 = arith.addf %144, %145 : vector<32x8xf32>
    %cst_60 = arith.constant 5.000000e-01 : f32
    %147 = vector.broadcast %cst_60 : f32 to vector<32x8xf32>
    %148 = arith.mulf %147, %146 : vector<32x8xf32>
    %cst_61 = arith.constant 0.707106769 : f32
    %149 = vector.broadcast %cst_61 : f32 to vector<32x8xf32>
    %150 = arith.mulf %146, %149 : vector<32x8xf32>
    %151 = math.erf %150 : vector<32x8xf32>
    %cst_62 = arith.constant 1.000000e+00 : f32
    %152 = vector.broadcast %cst_62 : f32 to vector<32x8xf32>
    %153 = arith.addf %152, %151 : vector<32x8xf32>
    %154 = arith.mulf %148, %153 : vector<32x8xf32>
    %155 = arith.truncf %154 : vector<32x8xf32> to vector<32x8xbf16>
    %cst_63 = arith.constant dense<0.000000e+00> : vector<32x8xf32>
    %156 = tpu.matmul %117, %155, %cst_63 {dimension_numbers = #tpu.dot_dimension_numbers<[1], [0], [0], [1], [0, 0, 1, 1], [], []>} : vector<32x32xbf16>, vector<32x8xbf16>, vector<32x8xf32> -> vector<32x8xf32>
    %157 = vector.extract_strided_slice %119 {offsets = [0, 2], sizes = [32, 1], strides = [1, 1]} : vector<32x4xf32> to vector<32x1xf32>
    %158 = vector.extract_strided_slice %119 {offsets = [0, 3], sizes = [32, 1], strides = [1, 1]} : vector<32x4xf32> to vector<32x1xf32>
    %cst_64 = arith.constant dense<0.000000e+00> : vector<32xf32>
    %159 = vector.multi_reduction <add>, %156, %cst_64 [1] : vector<32x8xf32> to vector<32xf32>
    %160 = vector.shape_cast %159 : vector<32xf32> to vector<32x1xf32>
    %161 = arith.mulf %156, %156 : vector<32x8xf32>
    %cst_65 = arith.constant dense<0.000000e+00> : vector<32xf32>
    %162 = vector.multi_reduction <add>, %161, %cst_65 [1] : vector<32x8xf32> to vector<32xf32>
    %163 = vector.shape_cast %162 : vector<32xf32> to vector<32x1xf32>
    %cst_66 = arith.constant 1.250000e-01 : f32
    %164 = vector.broadcast %cst_66 : f32 to vector<32x1xf32>
    %165 = arith.mulf %160, %164 : vector<32x1xf32>
    %cst_67 = arith.constant 1.250000e-01 : f32
    %166 = vector.broadcast %cst_67 : f32 to vector<32x1xf32>
    %167 = arith.mulf %163, %166 : vector<32x1xf32>
    %168 = arith.mulf %165, %165 : vector<32x1xf32>
    %169 = arith.subf %167, %168 : vector<32x1xf32>
    %cst_68 = arith.constant 0.000000e+00 : f32
    %170 = vector.broadcast %cst_68 : f32 to vector<32x1xf32>
    %171 = arith.maximumf %169, %170 : vector<32x1xf32>
    %cst_69 = arith.constant 9.99999974E-6 : f32
    %172 = vector.broadcast %cst_69 : f32 to vector<32x1xf32>
    %173 = arith.addf %171, %172 : vector<32x1xf32>
    %174 = math.rsqrt %173 : vector<32x1xf32>
    %175 = arith.mulf %174, %157 : vector<32x1xf32>
    %176 = vector.broadcast %165 : vector<32x1xf32> to vector<32x8xf32>
    %177 = arith.subf %156, %176 : vector<32x8xf32>
    %178 = vector.broadcast %175 : vector<32x1xf32> to vector<32x8xf32>
    %179 = arith.mulf %177, %178 : vector<32x8xf32>
    %180 = vector.broadcast %158 : vector<32x1xf32> to vector<32x8xf32>
    %181 = arith.addf %179, %180 : vector<32x8xf32>
    %182 = arith.addf %113, %181 : vector<32x8xf32>
    %cst_70 = arith.constant 5.000000e-01 : f32
    %183 = vector.broadcast %cst_70 : f32 to vector<32x8xf32>
    %184 = arith.mulf %183, %182 : vector<32x8xf32>
    %cst_71 = arith.constant 0.707106769 : f32
    %185 = vector.broadcast %cst_71 : f32 to vector<32x8xf32>
    %186 = arith.mulf %182, %185 : vector<32x8xf32>
    %187 = math.erf %186 : vector<32x8xf32>
    %cst_72 = arith.constant 1.000000e+00 : f32
    %188 = vector.broadcast %cst_72 : f32 to vector<32x8xf32>
    %189 = arith.addf %188, %187 : vector<32x8xf32>
    %190 = arith.mulf %184, %189 : vector<32x8xf32>
    %c2 = arith.constant 2 : index
    %c0_73 = arith.constant 0 : index
    %c0_74 = arith.constant 0 : index
    %191 = vector.load %arg3[%c2, %c0_73, %c0_74] : memref<3x32x32xbf16, #tpu.memory_space<vmem>>, vector<1x32x32xbf16>
    %192 = vector.shape_cast %191 : vector<1x32x32xbf16> to vector<32x32xbf16>
    %c2_75 = arith.constant 2 : index
    %c0_76 = arith.constant 0 : index
    %c0_77 = arith.constant 0 : index
    %193 = vector.load %arg4[%c2_75, %c0_76, %c0_77] : memref<3x32x32xbf16, #tpu.memory_space<vmem>>, vector<1x32x32xbf16>
    %194 = vector.shape_cast %193 : vector<1x32x32xbf16> to vector<32x32xbf16>
    %c2_78 = arith.constant 2 : index
    %c0_79 = arith.constant 0 : index
    %c0_80 = arith.constant 0 : index
    %195 = vector.load %arg5[%c2_78, %c0_79, %c0_80] : memref<3x32x4xf32, #tpu.memory_space<vmem>>, vector<1x32x4xf32>
    %196 = vector.shape_cast %195 : vector<1x32x4xf32> to vector<32x4xf32>
    %197 = arith.truncf %190 : vector<32x8xf32> to vector<32x8xbf16>
    %cst_81 = arith.constant dense<0.000000e+00> : vector<32x8xf32>
    %198 = tpu.matmul %192, %197, %cst_81 {dimension_numbers = #tpu.dot_dimension_numbers<[1], [0], [0], [1], [0, 0, 1, 1], [], []>} : vector<32x32xbf16>, vector<32x8xbf16>, vector<32x8xf32> -> vector<32x8xf32>
    %199 = vector.extract_strided_slice %196 {offsets = [0, 0], sizes = [32, 1], strides = [1, 1]} : vector<32x4xf32> to vector<32x1xf32>
    %200 = vector.extract_strided_slice %196 {offsets = [0, 1], sizes = [32, 1], strides = [1, 1]} : vector<32x4xf32> to vector<32x1xf32>
    %cst_82 = arith.constant dense<0.000000e+00> : vector<32xf32>
    %201 = vector.multi_reduction <add>, %198, %cst_82 [1] : vector<32x8xf32> to vector<32xf32>
    %202 = vector.shape_cast %201 : vector<32xf32> to vector<32x1xf32>
    %203 = arith.mulf %198, %198 : vector<32x8xf32>
    %cst_83 = arith.constant dense<0.000000e+00> : vector<32xf32>
    %204 = vector.multi_reduction <add>, %203, %cst_83 [1] : vector<32x8xf32> to vector<32xf32>
    %205 = vector.shape_cast %204 : vector<32xf32> to vector<32x1xf32>
    %cst_84 = arith.constant 1.250000e-01 : f32
    %206 = vector.broadcast %cst_84 : f32 to vector<32x1xf32>
    %207 = arith.mulf %202, %206 : vector<32x1xf32>
    %cst_85 = arith.constant 1.250000e-01 : f32
    %208 = vector.broadcast %cst_85 : f32 to vector<32x1xf32>
    %209 = arith.mulf %205, %208 : vector<32x1xf32>
    %210 = arith.mulf %207, %207 : vector<32x1xf32>
    %211 = arith.subf %209, %210 : vector<32x1xf32>
    %cst_86 = arith.constant 0.000000e+00 : f32
    %212 = vector.broadcast %cst_86 : f32 to vector<32x1xf32>
    %213 = arith.maximumf %211, %212 : vector<32x1xf32>
    %cst_87 = arith.constant 9.99999974E-6 : f32
    %214 = vector.broadcast %cst_87 : f32 to vector<32x1xf32>
    %215 = arith.addf %213, %214 : vector<32x1xf32>
    %216 = math.rsqrt %215 : vector<32x1xf32>
    %217 = arith.mulf %216, %199 : vector<32x1xf32>
    %218 = vector.broadcast %207 : vector<32x1xf32> to vector<32x8xf32>
    %219 = arith.subf %198, %218 : vector<32x8xf32>
    %220 = vector.broadcast %217 : vector<32x1xf32> to vector<32x8xf32>
    %221 = arith.mulf %219, %220 : vector<32x8xf32>
    %222 = vector.broadcast %200 : vector<32x1xf32> to vector<32x8xf32>
    %223 = arith.addf %221, %222 : vector<32x8xf32>
    %cst_88 = arith.constant 5.000000e-01 : f32
    %224 = vector.broadcast %cst_88 : f32 to vector<32x8xf32>
    %225 = arith.mulf %224, %223 : vector<32x8xf32>
    %cst_89 = arith.constant 0.707106769 : f32
    %226 = vector.broadcast %cst_89 : f32 to vector<32x8xf32>
    %227 = arith.mulf %223, %226 : vector<32x8xf32>
    %228 = math.erf %227 : vector<32x8xf32>
    %cst_90 = arith.constant 1.000000e+00 : f32
    %229 = vector.broadcast %cst_90 : f32 to vector<32x8xf32>
    %230 = arith.addf %229, %228 : vector<32x8xf32>
    %231 = arith.mulf %225, %230 : vector<32x8xf32>
    %232 = arith.truncf %231 : vector<32x8xf32> to vector<32x8xbf16>
    %cst_91 = arith.constant dense<0.000000e+00> : vector<32x8xf32>
    %233 = tpu.matmul %194, %232, %cst_91 {dimension_numbers = #tpu.dot_dimension_numbers<[1], [0], [0], [1], [0, 0, 1, 1], [], []>} : vector<32x32xbf16>, vector<32x8xbf16>, vector<32x8xf32> -> vector<32x8xf32>
    %234 = vector.extract_strided_slice %196 {offsets = [0, 2], sizes = [32, 1], strides = [1, 1]} : vector<32x4xf32> to vector<32x1xf32>
    %235 = vector.extract_strided_slice %196 {offsets = [0, 3], sizes = [32, 1], strides = [1, 1]} : vector<32x4xf32> to vector<32x1xf32>
    %cst_92 = arith.constant dense<0.000000e+00> : vector<32xf32>
    %236 = vector.multi_reduction <add>, %233, %cst_92 [1] : vector<32x8xf32> to vector<32xf32>
    %237 = vector.shape_cast %236 : vector<32xf32> to vector<32x1xf32>
    %238 = arith.mulf %233, %233 : vector<32x8xf32>
    %cst_93 = arith.constant dense<0.000000e+00> : vector<32xf32>
    %239 = vector.multi_reduction <add>, %238, %cst_93 [1] : vector<32x8xf32> to vector<32xf32>
    %240 = vector.shape_cast %239 : vector<32xf32> to vector<32x1xf32>
    %cst_94 = arith.constant 1.250000e-01 : f32
    %241 = vector.broadcast %cst_94 : f32 to vector<32x1xf32>
    %242 = arith.mulf %237, %241 : vector<32x1xf32>
    %cst_95 = arith.constant 1.250000e-01 : f32
    %243 = vector.broadcast %cst_95 : f32 to vector<32x1xf32>
    %244 = arith.mulf %240, %243 : vector<32x1xf32>
    %245 = arith.mulf %242, %242 : vector<32x1xf32>
    %246 = arith.subf %244, %245 : vector<32x1xf32>
    %cst_96 = arith.constant 0.000000e+00 : f32
    %247 = vector.broadcast %cst_96 : f32 to vector<32x1xf32>
    %248 = arith.maximumf %246, %247 : vector<32x1xf32>
    %cst_97 = arith.constant 9.99999974E-6 : f32
    %249 = vector.broadcast %cst_97 : f32 to vector<32x1xf32>
    %250 = arith.addf %248, %249 : vector<32x1xf32>
    %251 = math.rsqrt %250 : vector<32x1xf32>
    %252 = arith.mulf %251, %234 : vector<32x1xf32>
    %253 = vector.broadcast %242 : vector<32x1xf32> to vector<32x8xf32>
    %254 = arith.subf %233, %253 : vector<32x8xf32>
    %255 = vector.broadcast %252 : vector<32x1xf32> to vector<32x8xf32>
    %256 = arith.mulf %254, %255 : vector<32x8xf32>
    %257 = vector.broadcast %235 : vector<32x1xf32> to vector<32x8xf32>
    %258 = arith.addf %256, %257 : vector<32x8xf32>
    %259 = arith.addf %190, %258 : vector<32x8xf32>
    %cst_98 = arith.constant 5.000000e-01 : f32
    %260 = vector.broadcast %cst_98 : f32 to vector<32x8xf32>
    %261 = arith.mulf %260, %259 : vector<32x8xf32>
    %cst_99 = arith.constant 0.707106769 : f32
    %262 = vector.broadcast %cst_99 : f32 to vector<32x8xf32>
    %263 = arith.mulf %259, %262 : vector<32x8xf32>
    %264 = math.erf %263 : vector<32x8xf32>
    %cst_100 = arith.constant 1.000000e+00 : f32
    %265 = vector.broadcast %cst_100 : f32 to vector<32x8xf32>
    %266 = arith.addf %265, %264 : vector<32x8xf32>
    %267 = arith.mulf %261, %266 : vector<32x8xf32>
    %c0_101 = arith.constant 0 : index
    %c0_102 = arith.constant 0 : index
    %268 = vector.load %arg6[%c0_101, %c0_102] : memref<32x32xbf16, #tpu.memory_space<vmem>>, vector<32x32xbf16>
    %269 = arith.truncf %267 : vector<32x8xf32> to vector<32x8xbf16>
    %cst_103 = arith.constant dense<0.000000e+00> : vector<32x8xf32>
    %270 = tpu.matmul %268, %269, %cst_103 {dimension_numbers = #tpu.dot_dimension_numbers<[1], [0], [0], [1], [0, 0, 1, 1], [], []>} : vector<32x32xbf16>, vector<32x8xbf16>, vector<32x8xf32> -> vector<32x8xf32>
    %c0_104 = arith.constant 0 : index
    %c0_105 = arith.constant 0 : index
    %271 = vector.load %arg7[%c0_104, %c0_105] : memref<32x2xf32, #tpu.memory_space<vmem>>, vector<32x1xf32>
    %c0_106 = arith.constant 0 : index
    %c1_107 = arith.constant 1 : index
    %272 = vector.load %arg7[%c0_106, %c1_107] : memref<32x2xf32, #tpu.memory_space<vmem>>, vector<32x1xf32>
    %cst_108 = arith.constant dense<0.000000e+00> : vector<32xf32>
    %273 = vector.multi_reduction <add>, %270, %cst_108 [1] : vector<32x8xf32> to vector<32xf32>
    %274 = vector.shape_cast %273 : vector<32xf32> to vector<32x1xf32>
    %275 = arith.mulf %270, %270 : vector<32x8xf32>
    %cst_109 = arith.constant dense<0.000000e+00> : vector<32xf32>
    %276 = vector.multi_reduction <add>, %275, %cst_109 [1] : vector<32x8xf32> to vector<32xf32>
    %277 = vector.shape_cast %276 : vector<32xf32> to vector<32x1xf32>
    %cst_110 = arith.constant 1.250000e-01 : f32
    %278 = vector.broadcast %cst_110 : f32 to vector<32x1xf32>
    %279 = arith.mulf %274, %278 : vector<32x1xf32>
    %cst_111 = arith.constant 1.250000e-01 : f32
    %280 = vector.broadcast %cst_111 : f32 to vector<32x1xf32>
    %281 = arith.mulf %277, %280 : vector<32x1xf32>
    %282 = arith.mulf %279, %279 : vector<32x1xf32>
    %283 = arith.subf %281, %282 : vector<32x1xf32>
    %cst_112 = arith.constant 0.000000e+00 : f32
    %284 = vector.broadcast %cst_112 : f32 to vector<32x1xf32>
    %285 = arith.maximumf %283, %284 : vector<32x1xf32>
    %cst_113 = arith.constant 9.99999974E-6 : f32
    %286 = vector.broadcast %cst_113 : f32 to vector<32x1xf32>
    %287 = arith.addf %285, %286 : vector<32x1xf32>
    %288 = math.rsqrt %287 : vector<32x1xf32>
    %289 = arith.mulf %288, %271 : vector<32x1xf32>
    %290 = vector.broadcast %279 : vector<32x1xf32> to vector<32x8xf32>
    %291 = arith.subf %270, %290 : vector<32x8xf32>
    %292 = vector.broadcast %289 : vector<32x1xf32> to vector<32x8xf32>
    %293 = arith.mulf %291, %292 : vector<32x8xf32>
    %294 = vector.broadcast %272 : vector<32x1xf32> to vector<32x8xf32>
    %295 = arith.addf %293, %294 : vector<32x8xf32>
    %cst_114 = arith.constant 5.000000e-01 : f32
    %296 = vector.broadcast %cst_114 : f32 to vector<32x8xf32>
    %297 = arith.mulf %296, %295 : vector<32x8xf32>
    %cst_115 = arith.constant 0.707106769 : f32
    %298 = vector.broadcast %cst_115 : f32 to vector<32x8xf32>
    %299 = arith.mulf %295, %298 : vector<32x8xf32>
    %300 = math.erf %299 : vector<32x8xf32>
    %cst_116 = arith.constant 1.000000e+00 : f32
    %301 = vector.broadcast %cst_116 : f32 to vector<32x8xf32>
    %302 = arith.addf %301, %300 : vector<32x8xf32>
    %303 = arith.mulf %297, %302 : vector<32x8xf32>
    %c0_117 = arith.constant 0 : index
    %c0_118 = arith.constant 0 : index
    %304 = vector.load %arg8[%c0_117, %c0_118] : memref<8x32xbf16, #tpu.memory_space<vmem>>, vector<8x32xbf16>
    %305 = arith.truncf %303 : vector<32x8xf32> to vector<32x8xbf16>
    %cst_119 = arith.constant dense<0.000000e+00> : vector<8x8xf32>
    %306 = tpu.matmul %304, %305, %cst_119 {dimension_numbers = #tpu.dot_dimension_numbers<[1], [0], [0], [1], [0, 0, 1, 1], [], []>} : vector<8x32xbf16>, vector<32x8xbf16>, vector<8x8xf32> -> vector<8x8xf32>
    %c0_120 = arith.constant 0 : index
    %c0_121 = arith.constant 0 : index
    %307 = vector.load %arg9[%c0_120, %c0_121] : memref<8x1xf32, #tpu.memory_space<vmem>>, vector<8x1xf32>
    %308 = vector.broadcast %307 : vector<8x1xf32> to vector<8x8xf32>
    %309 = arith.addf %306, %308 : vector<8x8xf32>
    %c0_122 = arith.constant 0 : index
    %c0_123 = arith.constant 0 : index
    %310 = vector.load %arg10[%c0_122, %c0_123] : memref<8x8xf32, #tpu.memory_space<vmem>>, vector<8x8xf32>
    tpu.vector_store %arg10[%c0_122, %c0_123], %309 {strides = array<i32>} : memref<8x8xf32, #tpu.memory_space<vmem>>, vector<8x8xf32>,
    return
  }
}

</mosaic_0001>

<bundles_post_ra>
// kernel: tpu_custom_call.1
= control target key start
LH: loop header
LB: loop body
LE: loop exit
PB: predicated region body
PF: predicated region fallthrough
CT: control target
= control target key end

     0   :  { %vm53_vm0 = vcmask 130048   ;;  %s2932_s0 = inlined_call_operand.vmem [shape: f32[8,16], index: 0, kind: input, shape index: {}]   ;;  %s2933_s1 = inlined_call_operand.vmem [shape: bf16[32,16], index: 1, kind: input, shape index: {}]   ;;  %s2934_s2 = inlined_call_operand.vmem [shape: f32[32,2], index: 2, kind: input, shape index: {}]   ;;  %s2935_s3 = inlined_call_operand.vmem [shape: bf16[3,32,32], index: 3, kind: input, shape index: {}]   ;;  %s2936_s4 = inlined_call_operand.vmem [shape: bf16[3,32,32], index: 4, kind: input, shape index: {}]   ;;  %s2937_s5 = inlined_call_operand.vmem [shape: f32[3,32,4], index: 5, kind: input, shape index: {}]   ;;  %s2938_s6 = inlined_call_operand.vmem [shape: bf16[32,32], index: 6, kind: input, shape index: {}]   ;;  %s2939_s7 = inlined_call_operand.vmem [shape: f32[32,2], index: 7, kind: input, shape index: {}]   ;;  %s2940_s8 = inlined_call_operand.vmem [shape: bf16[8,32], index: 8, kind: input, shape index: {}]   ;;  %s2941_s9 = inlined_call_operand.vmem [shape: f32[8,1], index: 9, kind: input, shape index: {}]   ;;  %s2942_s10 = inlined_call_operand.hbm [shape: f32[8,8], index: 10, kind: output, shape index: {}]  }
   0x1   :  { %v37_v0 = vld [vmem:[%s2932_s0] sm:$0xff]  ;;  %v1967_v4 = vld [vmem:[%s2933_s1 + $0x8] sm:$0xff]  }
   0x2   :  { %v38_v1 = vpack.c.bf16 %v37_v0, %v37_v0  ;;  %v1966_v2 = vld [vmem:[%s2933_s1] sm:$0xff]  }
   0x3   :  { %1853 = vmatprep.mubr.msk.bf16.mxu0 %vm53_vm0, %v1966_v2 }
   0x4   :  { %1921 = vmatprep.subr.msk.bf16.mxu0 %vm53_vm0, %v38_v1  ;;  %v61_v3 = vsel %vm53_vm0, %v38_v1, 0 }
   0x5   :  { %1852 = vmatpush3.bf16.xpose.msra.mxu0 %v61_v3 }
   0xc   :  { %1854 = vmatmul.mubr.msk.bf16.vlgmr.msra.gmra.mrb[0].mxu0 %vm53_vm0, %v1967_v4 }
   0xd   :  { %15 = vsyncpa [#allocation3], 0  ;;  %vm116_vm1 = vcmask 64512   ;;  %v2134_v21 = vmov 1   ;;  %v112_v22 = vld [vmem:[%s2934_s2] sm:$0xff]  ;;  %v113_v23 = vld [vmem:[%s2934_s2 + $0x8] sm:$0xff] }
   0xe   :  { %1930 = vset.pattern.permute.xlu1 %v2134_v21  ;;  %v2135_v24 = vmov 0   ;;  %v114_v63 = vld [vmem:[%s2934_s2 + $0x10] sm:$0xff]  ;;  %v115_v3 = vld [vmem:[%s2934_s2 + $0x18] sm:$0xff]  ;;  %vm273_vm2 = vcmask 261120   ;;  %vm2139_vm3 = vmmov 0   ;;  %s2140_s16 = smov [#allocation2]  }
   0xf   :  { %1929 = vset.pattern.permute.xlu0 %v2135_v24 }
  0xdf   :  { %v2205_v5 = vpop.f32.mrb[0].mxu0 }
  0xe0   :  { %v2207_v6 = vpop.f32.mrb[1].mxu0  ;;  %v123_v15 = vsel %vm116_vm1, %v2205_v5, 0.0  ;;  %v131_v16 = vmul.f32 %v2205_v5, %v2205_v5 }
  0xe1   :  { %v2209_v7 = vpop.f32.mrb[2].mxu0  ;;  %v117_v8 = vsel %vm116_vm1, %v2207_v6, 0.0  ;;  %v129_v11 = vmul.f32 %v2207_v6, %v2207_v6 }
  0xe2   :  { %118 = vadd.xlane.f32.xlu0 %v117_v8  ;;  %v2213_v9 = vpop.f32.mrb[3].mxu0  ;;  %v126_v10 = vsel %vm116_vm1, %v2209_v7, 0.0  ;;  %v132_v18 = vmul.f32 %v2209_v7, %v2209_v7  ;;  %v139_v19 = vsel %vm116_vm1, %v131_v16, 0.0  ;;  %v1968_v8 = vld [vmem:[%s2935_s3] sm:$0xff]  }
  0xe3   :  { %127 = vadd.xlane.f32.xlu1 %v126_v10  ;;  %v120_v12 = vsel %vm116_vm1, %v2213_v9, 0.0  ;;  %v133_v13 = vsel %vm116_vm1, %v129_v11, 0.0  ;;  %v130_v14 = vmul.f32 %v2213_v9, %v2213_v9  ;;  %1861 = vmatprep.mubr.msk.bf16.mxu1 %vm273_vm2, %v1968_v8 }
  0xe4   :  { %v142_v20 = vsel %vm116_vm1, %v132_v18, 0.0 }
  0xe5   :  { %v136_v17 = vsel %vm116_vm1, %v130_v14, 0.0 }
  0xe6   :  { %121 = vadd.xlane.f32.xlu0 %v120_v12 }
  0xe7   :  { %134 = vadd.xlane.f32.xlu1 %v133_v13 }
  0xea   :  { %124 = vadd.xlane.f32.xlu0 %v123_v15 }
  0xeb   :  { %137 = vadd.xlane.f32.xlu1 %v136_v17 }
  0xee   :  { %140 = vadd.xlane.f32.xlu0 %v139_v19 }
  0xef   :  { %143 = vadd.xlane.f32.xlu1 %v142_v20 }
 0x100   :  { %207 = vperm.xlu1 %1930, %v112_v22  }
 0x104   :  { %212 = vperm.xlu1 %1930, %v113_v23  }
 0x108   :  { %1931 = vset.pattern.permute.xlu1 %v2135_v24 }
 0x16f   :  { %v119_v25 = vpop.xlane.xlu0 %118 }
 0x170   :  { %v2242_v26 = vmul.f32 0.125, %v119_v25  ;;  %v128_v27 = vpop.xlane.xlu1 %127 }
 0x171   :  { %v2244_v28 = vmul.f32 0.125, %v128_v27 }
 0x172   :  { %v177_v29 = vsub.f32 %v2207_v6, %v2242_v26  ;;  %v153_v34 = vmul.f32 %v2242_v26, %v2242_v26 }
 0x173   :  { %v122_v30 = vpop.xlane.xlu0 %121  ;;  %v180_v31 = vsub.f32 %v2209_v7, %v2244_v28  ;;  %v156_v50 = vmul.f32 %v2244_v28, %v2244_v28 }
 0x174   :  { %v2250_v32 = vmul.f32 0.125, %v122_v30  ;;  %v135_v33 = vpop.xlane.xlu1 %134 }
 0x175   :  { %v149_v35 = vmul.f32 0.125, %v135_v33 }
 0x176   :  { %v178_v36 = vsub.f32 %v2213_v9, %v2250_v32  ;;  %v154_v46 = vmul.f32 %v2250_v32, %v2250_v32 }
 0x177   :  { %v157_v37 = vsub.f32 %v149_v35, %v153_v34  ;;  %v125_v38 = vpop.xlane.xlu0 %124 }
 0x178   :  { %v147_v39 = vmul.f32 0.125, %v125_v38  ;;  %v138_v40 = vpop.xlane.xlu1 %137 }
 0x179   :  { %v161_v41 = vmax.f32 %v157_v37, 0.0  ;;  %v150_v43 = vmul.f32 0.125, %v138_v40 }
 0x17a   :  { %v179_v42 = vsub.f32 %v2205_v5, %v147_v39  ;;  %v155_v47 = vmul.f32 %v147_v39, %v147_v39 }
 0x17b   :  { %v165_v44 = vadd.f32 1e-05, %v161_v41  ;;  %v141_v45 = vpop.xlane.xlu0 %140  ;;  %v158_v52 = vsub.f32 %v150_v43, %v154_v46 }
 0x17c   :  { %v151_v48 = vmul.f32 0.125, %v141_v45  ;;  %v144_v49 = vpop.xlane.xlu1 %143 }
 0x17d   :  { %1982 = vrsqrt.f32 %v165_v44  ;;  %v152_v51 = vmul.f32 0.125, %v144_v49  ;;  %v162_v57 = vmax.f32 %v158_v52, 0.0 }
 0x17e   :  { %v159_v53 = vsub.f32 %v151_v48, %v155_v47  ;;  %v1969_v48 = vld [vmem:[%s2935_s3 + $0x8] sm:$0xff]  }
 0x17f   :  { %v160_v54 = vsub.f32 %v152_v51, %v156_v50  ;;  %v166_v60 = vadd.f32 1e-05, %v162_v57 }
 0x180   :  { %v163_v55 = vmax.f32 %v159_v53, 0.0  ;;  %v208_v9 = vpop.permute.xlu1 %207 }
 0x181   :  { %v164_v56 = vmax.f32 %v160_v54, 0.0 }
 0x182   :  { %v167_v58 = vadd.f32 1e-05, %v163_v55 }
 0x183   :  { %v168_v59 = vadd.f32 1e-05, %v164_v56 }
 0x184   :  { %1984 = vrsqrt.f32 %v167_v58  ;;  %v213_v10 = vpop.permute.xlu1 %212 }
 0x185   :  { %1986 = vrsqrt.f32 %v168_v59 }
 0x186   :  { %1988 = vrsqrt.f32 %v166_v60 }
 0x187   :  { %v1983_v61 = vpop.eup %1982 }
 0x188   :  { %v173_v62 = vmul.f32 %v1983_v61, %v112_v22 }
 0x18a   :  { %183 = vperm.xlu0 %1929, %v173_v62  }
 0x18e   :  { %v1985_v0 = vpop.eup %1984  ;;  %1933 = vset.pattern.permute.xlu0 %v2134_v21 }
 0x18f   :  { %v175_v1 = vmul.f32 %v1985_v0, %v114_v63  ;;  %v1987_v2 = vpop.eup %1986 }
 0x190   :  { %v176_v4 = vmul.f32 %v1987_v2, %v115_v3  ;;  %v1989_v5 = vpop.eup %1988  ;;  %v2330_v2 = vld [vmem:[%s2937_s5 + $0x8] sm:$0xff] }
 0x191   :  { %193 = vperm.xlu1 %1931, %v175_v1   ;;  %v174_v6 = vmul.f32 %v1989_v5, %v113_v23  ;;  %v2323_v1 = vld [vmem:[%s2937_s5] sm:$0xff] }
 0x195   :  { %198 = vperm.xlu1 %1931, %v176_v4  }
 0x199   :  { %188 = vperm.xlu1 %1931, %v174_v6  }
 0x19d   :  { %1932 = vset.pattern.permute.xlu1 %v2134_v21 }
 0x19e   :  { %217 = vperm.xlu1 %1932, %v114_v63  }
 0x1a2   :  { %222 = vperm.xlu1 %1932, %v115_v3  }
 0x209   :  { %v184_v11 = vpop.permute.xlu0 %183 }
 0x20a   :  { %v201_v12 = vmul.f32 %v184_v11, %v177_v29 }
 0x20c   :  { %v225_v14 = vadd.f32 %v208_v9, %v201_v12 }
 0x20e   :  { %v233_v16 = vmul.f32 0.70710677, %v225_v14 }
 0x210   :  { %v194_v13 = vpop.permute.xlu1 %193  ;;  %1990 = verf.f32 %v233_v16 }
 0x211   :  { %v203_v20 = vmul.f32 %v194_v13, %v179_v42 }
 0x214   :  { %v199_v15 = vpop.permute.xlu1 %198 }
 0x215   :  { %v204_v26 = vmul.f32 %v199_v15, %v180_v31 }
 0x218   :  { %v189_v17 = vpop.permute.xlu1 %188 }
 0x219   :  { %v202_v18 = vmul.f32 %v189_v17, %v178_v36  ;;  %v229_v36 = vmul.f32 0.5, %v225_v14 }
 0x21a   :  { %v1991_v33 = vpop.eup %1990 }
 0x21b   :  { %v226_v19 = vadd.f32 %v213_v10, %v202_v18  ;;  %v241_v34 = vadd.f32 1.0, %v1991_v33 }
 0x21d   :  { %v234_v22 = vmul.f32 0.70710677, %v226_v19  ;;  %v218_v23 = vpop.permute.xlu1 %217  ;;  %v230_v37 = vmul.f32 0.5, %v226_v19  ;;  %v2276_v40 = vmul.f32 %v241_v34, %v229_v36 }
 0x21e   :  { %v227_v25 = vadd.f32 %v218_v23, %v203_v20 }
 0x21f   :  { %1992 = verf.f32 %v234_v22 }
 0x220   :  { %v235_v27 = vmul.f32 0.70710677, %v227_v25  ;;  %v231_v42 = vmul.f32 0.5, %v227_v25 }
 0x221   :  { %v223_v30 = vpop.permute.xlu1 %222 }
 0x222   :  { %1994 = verf.f32 %v235_v27  ;;  %v228_v29 = vadd.f32 %v223_v30, %v204_v26 }
 0x224   :  { %v236_v32 = vmul.f32 0.70710677, %v228_v29  ;;  %v232_v43 = vmul.f32 0.5, %v228_v29 }
 0x226   :  { %1996 = verf.f32 %v236_v32 }
 0x229   :  { %v1993_v35 = vpop.eup %1992 }
 0x22a   :  { %v242_v38 = vadd.f32 1.0, %v1993_v35 }
 0x22c   :  { %v1995_v39 = vpop.eup %1994  ;;  %v2278_v41 = vmul.f32 %v242_v38, %v230_v37 }
 0x22d   :  { %v243_v28 = vadd.f32 1.0, %v1995_v39 }
 0x22e   :  { %v261_v7 = vpack.c.bf16 %v2278_v41, %v2276_v40 }
 0x22f   :  { %v2282_v45 = vmul.f32 %v243_v28, %v231_v42 }
 0x230   :  { %v1997_v31 = vpop.eup %1996  ;;  %1857 = vmatprep.subr.bf16.mxu1 %v261_v7 }
 0x231   :  { %v244_v44 = vadd.f32 1.0, %v1997_v31  ;;  %1858 = vmatpush3.bf16.msra.mxu1 %v261_v7 }
 0x233   :  { %v2284_v46 = vmul.f32 %v244_v44, %v232_v43 }
 0x235   :  { %v262_v47 = vpack.c.bf16 %v2284_v46, %v2282_v45 }
 0x237   :  { %1859 = vmatprep.subr.bf16.mxu1 %v262_v47 }
 0x238   :  { %1860 = vmatpush3.bf16.msra.mxu1 %v262_v47  ;;  %v2357_v47 = vld [vmem:[%s2937_s5 + $0x10] sm:$0xff] }
 0x23b   :  { %1862 = vmatmul.mubr.msk.bf16.vlgmr.msra.gmra.mrb[0].mxu1 %vm273_vm2, %v1969_v48 }
 0x30e   :  { %v2292_v49 = vpop.f32.mrb[0].mxu1 }
 0x30f   :  { %v2294_v50 = vpop.f32.mrb[1].mxu1  ;;  %v335_v51 = vsel %vm116_vm1, %v2292_v49, 0.0  ;;  %v343_v60 = vmul.f32 %v2292_v49, %v2292_v49 }
 0x310   :  { %336 = vadd.xlane.f32.xlu0 %v335_v51  ;;  %v2298_v52 = vpop.f32.mrb[2].mxu1  ;;  %v329_v53 = vsel %vm116_vm1, %v2294_v50, 0.0  ;;  %v341_v56 = vmul.f32 %v2294_v50, %v2294_v50 }
 0x311   :  { %330 = vadd.xlane.f32.xlu1 %v329_v53  ;;  %v2302_v54 = vpop.f32.mrb[3].mxu1  ;;  %v338_v57 = vsel %vm116_vm1, %v2298_v52, 0.0  ;;  %v344_v62 = vmul.f32 %v2298_v52, %v2298_v52  ;;  %v351_v63 = vsel %vm116_vm1, %v343_v60, 0.0 }
 0x312   :  { %v332_v55 = vsel %vm116_vm1, %v2302_v54, 0.0  ;;  %v342_v58 = vmul.f32 %v2302_v54, %v2302_v54  ;;  %v345_v59 = vsel %vm116_vm1, %v341_v56, 0.0  ;;  %v1970_v56 = vld [vmem:[%s2936_s4] sm:$0xff]  }
 0x313   :  { %v354_v0 = vsel %vm116_vm1, %v344_v62, 0.0  ;;  %1869 = vmatprep.mubr.msk.bf16.mxu0 %vm273_vm2, %v1970_v56 }
 0x314   :  { %333 = vadd.xlane.f32.xlu0 %v332_v55  ;;  %v348_v61 = vsel %vm116_vm1, %v342_v58, 0.0 }
 0x315   :  { %339 = vadd.xlane.f32.xlu1 %v338_v57 }
 0x318   :  { %346 = vadd.xlane.f32.xlu0 %v345_v59 }
 0x319   :  { %349 = vadd.xlane.f32.xlu1 %v348_v61 }
 0x31c   :  { %352 = vadd.xlane.f32.xlu0 %v351_v63 }
 0x31d   :  { %355 = vadd.xlane.f32.xlu1 %v354_v0 }
 0x32e   :  { %419 = vperm.xlu1 %1932, %v2323_v1  }
 0x332   :  { %1934 = vset.pattern.permute.xlu1 %v2135_v24  ;;  %424 = vperm.xlu0 %1933, %v2330_v2  }
 0x336   :  { %1935 = vset.pattern.permute.xlu0 %v2135_v24 }
 0x39d   :  { %v337_v3 = vpop.xlane.xlu0 %336 }
 0x39e   :  { %v2334_v4 = vmul.f32 0.125, %v337_v3  ;;  %v331_v5 = vpop.xlane.xlu1 %330 }
 0x39f   :  { %v357_v6 = vmul.f32 0.125, %v331_v5 }
 0x3a0   :  { %v391_v8 = vsub.f32 %v2292_v49, %v2334_v4  ;;  %v367_v27 = vmul.f32 %v2334_v4, %v2334_v4 }
 0x3a1   :  { %v334_v9 = vpop.xlane.xlu0 %333  ;;  %v389_v10 = vsub.f32 %v2294_v50, %v357_v6  ;;  %v365_v17 = vmul.f32 %v357_v6, %v357_v6 }
 0x3a2   :  { %v2339_v11 = vmul.f32 0.125, %v334_v9  ;;  %v340_v12 = vpop.xlane.xlu1 %339 }
 0x3a3   :  { %v2341_v13 = vmul.f32 0.125, %v340_v12 }
 0x3a4   :  { %v390_v14 = vsub.f32 %v2302_v54, %v2339_v11  ;;  %v366_v20 = vmul.f32 %v2339_v11, %v2339_v11  ;;  %v2366_v54 = vld [vmem:[%s2937_s5 + $0x18] sm:$0xff] }
 0x3a5   :  { %v347_v15 = vpop.xlane.xlu0 %346  ;;  %v392_v16 = vsub.f32 %v2298_v52, %v2341_v13  ;;  %v368_v33 = vmul.f32 %v2341_v13, %v2341_v13 }
 0x3a6   :  { %v361_v18 = vmul.f32 0.125, %v347_v15  ;;  %v350_v19 = vpop.xlane.xlu1 %349 }
 0x3a7   :  { %v362_v22 = vmul.f32 0.125, %v350_v19 }
 0x3a8   :  { %v369_v23 = vsub.f32 %v361_v18, %v365_v17 }
 0x3a9   :  { %v370_v25 = vsub.f32 %v362_v22, %v366_v20  ;;  %v353_v26 = vpop.xlane.xlu0 %352 }
 0x3aa   :  { %v373_v30 = vmax.f32 %v369_v23, 0.0  ;;  %v363_v29 = vmul.f32 0.125, %v353_v26  ;;  %v356_v32 = vpop.xlane.xlu1 %355 }
 0x3ab   :  { %v364_v34 = vmul.f32 0.125, %v356_v32  ;;  %v374_v36 = vmax.f32 %v370_v25, 0.0 }
 0x3ac   :  { %v377_v35 = vadd.f32 1e-05, %v373_v30  ;;  %v371_v37 = vsub.f32 %v363_v29, %v367_v27 }
 0x3ad   :  { %v372_v38 = vsub.f32 %v364_v34, %v368_v33  ;;  %v378_v7 = vadd.f32 1e-05, %v374_v36 }
 0x3ae   :  { %1998 = vrsqrt.f32 %v377_v35  ;;  %v375_v39 = vmax.f32 %v371_v37, 0.0  ;;  %v420_v58 = vpop.permute.xlu1 %419  ;;  %v1971_v37 = vld [vmem:[%s2936_s4 + $0x8] sm:$0xff]  }
 0x3af   :  { %v376_v31 = vmax.f32 %v372_v38, 0.0 }
 0x3b0   :  { %v379_v28 = vadd.f32 1e-05, %v375_v39 }
 0x3b1   :  { %v380_v42 = vadd.f32 1e-05, %v376_v31  ;;  %v425_v57 = vpop.permute.xlu0 %424 }
 0x3b2   :  { %2000 = vrsqrt.f32 %v379_v28 }
 0x3b3   :  { %2002 = vrsqrt.f32 %v378_v7 }
 0x3b4   :  { %2004 = vrsqrt.f32 %v380_v42 }
 0x3b8   :  { %v1999_v43 = vpop.eup %1998 }
 0x3b9   :  { %v385_v44 = vmul.f32 %v1999_v43, %v2323_v1 }
 0x3bb   :  { %395 = vperm.xlu0 %1935, %v385_v44  }
 0x3bc   :  { %v2001_v48 = vpop.eup %2000 }
 0x3bd   :  { %v387_v49 = vmul.f32 %v2001_v48, %v2357_v47  ;;  %v2003_v50 = vpop.eup %2002 }
 0x3be   :  { %v386_v51 = vmul.f32 %v2003_v50, %v2330_v2  ;;  %v2005_v53 = vpop.eup %2004 }
 0x3bf   :  { %405 = vperm.xlu1 %1934, %v387_v49   ;;  %1936 = vset.pattern.permute.xlu0 %v2134_v21  ;;  %v388_v55 = vmul.f32 %v2005_v53, %v2366_v54 }
 0x3c0   :  { %429 = vperm.xlu0 %1936, %v2357_v47  }
 0x3c3   :  { %400 = vperm.xlu1 %1934, %v386_v51  }
 0x3c7   :  { %410 = vperm.xlu1 %1934, %v388_v55  }
 0x3cb   :  { %1937 = vset.pattern.permute.xlu1 %v2134_v21 }
 0x3cc   :  { %434 = vperm.xlu1 %1937, %v2366_v54  }
 0x43a   :  { %v396_v59 = vpop.permute.xlu0 %395 }
 0x43b   :  { %v413_v60 = vmul.f32 %v396_v59, %v389_v10 }
 0x43d   :  { %v437_v61 = vadd.f32 %v420_v58, %v413_v60  ;;  %v2136_v58 = vmov 2  }
 0x43e   :  { %v406_v62 = vpop.permute.xlu1 %405  ;;  %1938 = vset.pattern.permute.xlu1 %v2136_v58  ;;  %1939 = vset.pattern.permute.xlu0 %v2136_v58 }
 0x43f   :  { %v415_v63 = vmul.f32 %v406_v62, %v391_v8  ;;  %v445_v0 = vmul.f32 0.70710677, %v437_v61  ;;  %v430_v3 = vpop.permute.xlu0 %429 }
 0x441   :  { %v439_v6 = vadd.f32 %v430_v3, %v415_v63  ;;  %2006 = verf.f32 %v445_v0 }
 0x442   :  { %v401_v4 = vpop.permute.xlu1 %400 }
 0x443   :  { %v414_v5 = vmul.f32 %v401_v4, %v390_v14  ;;  %v447_v15 = vmul.f32 0.70710677, %v439_v6  ;;  %v441_v14 = vmul.f32 0.5, %v437_v61  ;;  %v443_v52 = vmul.f32 0.5, %v439_v6 }
 0x445   :  { %v438_v9 = vadd.f32 %v425_v57, %v414_v5 }
 0x446   :  { %v411_v11 = vpop.permute.xlu1 %410 }
 0x447   :  { %v446_v12 = vmul.f32 0.70710677, %v438_v9  ;;  %v416_v17 = vmul.f32 %v411_v11, %v392_v16  ;;  %v442_v23 = vmul.f32 0.5, %v438_v9 }
 0x449   :  { %2008 = verf.f32 %v446_v12 }
 0x44a   :  { %2010 = verf.f32 %v447_v15 }
 0x44b   :  { %v435_v18 = vpop.permute.xlu1 %434  ;;  %v2007_v8 = vpop.eup %2006 }
 0x44c   :  { %v440_v10 = vadd.f32 %v435_v18, %v416_v17  ;;  %v453_v20 = vadd.f32 1.0, %v2007_v8 }
 0x44e   :  { %v448_v19 = vmul.f32 0.70710677, %v440_v10  ;;  %v457_v27 = vmul.f32 %v453_v20, %v441_v14  ;;  %v444_v13 = vmul.f32 0.5, %v440_v10 }
 0x450   :  { %2012 = verf.f32 %v448_v19 }
 0x453   :  { %v2009_v22 = vpop.eup %2008 }
 0x454   :  { %v454_v25 = vadd.f32 1.0, %v2009_v22  ;;  %v2011_v26 = vpop.eup %2010 }
 0x455   :  { %v455_v32 = vadd.f32 1.0, %v2011_v26 }
 0x456   :  { %v458_v30 = vmul.f32 %v454_v25, %v442_v23 }
 0x457   :  { %v459_v34 = vmul.f32 %v455_v32, %v443_v52 }
 0x458   :  { %v461_v29 = vpack.c.bf16 %v458_v30, %v457_v27 }
 0x45a   :  { %v2013_v33 = vpop.eup %2012  ;;  %1865 = vmatprep.subr.bf16.mxu0 %v461_v29 }
 0x45b   :  { %v456_v16 = vadd.f32 1.0, %v2013_v33  ;;  %1866 = vmatpush3.bf16.msra.mxu0 %v461_v29 }
 0x45d   :  { %v460_v35 = vmul.f32 %v456_v16, %v444_v13 }
 0x45f   :  { %v462_v36 = vpack.c.bf16 %v460_v35, %v459_v34 }
 0x461   :  { %1867 = vmatprep.subr.bf16.mxu0 %v462_v36 }
 0x462   :  { %1868 = vmatpush3.bf16.msra.mxu0 %v462_v36 }
 0x465   :  { %1870 = vmatmul.mubr.msk.bf16.vlgmr.msra.gmra.mrb[4].mxu0 %vm273_vm2, %v1971_v37 }
 0x538   :  { %v2382_v38 = vpop.f32.mrb[4].mxu0 }
 0x539   :  { %v2384_v39 = vpop.f32.mrb[5].mxu0  ;;  %v534_v48 = vsel %vm116_vm1, %v2382_v38, 0.0  ;;  %v542_v49 = vmul.f32 %v2382_v38, %v2382_v38 }
 0x53a   :  { %v2386_v7 = vpop.f32.mrb[6].mxu0  ;;  %v528_v28 = vsel %vm116_vm1, %v2384_v39, 0.0  ;;  %v540_v44 = vmul.f32 %v2384_v39, %v2384_v39 }
 0x53b   :  { %529 = vadd.xlane.f32.xlu0 %v528_v28  ;;  %v2390_v31 = vpop.f32.mrb[7].mxu0  ;;  %v537_v43 = vsel %vm116_vm1, %v2386_v7, 0.0  ;;  %v550_v53 = vsel %vm116_vm1, %v542_v49, 0.0  ;;  %v543_v56 = vmul.f32 %v2386_v7, %v2386_v7 }
 0x53c   :  { %v531_v42 = vsel %vm116_vm1, %v2390_v31, 0.0  ;;  %v544_v50 = vsel %vm116_vm1, %v540_v44, 0.0  ;;  %v541_v51 = vmul.f32 %v2390_v31, %v2390_v31 }
 0x53d   :  { %532 = vadd.xlane.f32.xlu1 %v531_v42  ;;  %v553_v57 = vsel %vm116_vm1, %v543_v56, 0.0  ;;  %v2137_v42 = vmov 3  }
 0x53e   :  { %v547_v55 = vsel %vm116_vm1, %v541_v51, 0.0 }
 0x53f   :  { %538 = vadd.xlane.f32.xlu0 %v537_v43 }
 0x541   :  { %535 = vadd.xlane.f32.xlu1 %v534_v48 }
 0x543   :  { %545 = vadd.xlane.f32.xlu0 %v544_v50 }
 0x545   :  { %551 = vadd.xlane.f32.xlu1 %v550_v53 }
 0x547   :  { %548 = vadd.xlane.f32.xlu0 %v547_v55 }
 0x54b   :  { %554 = vadd.xlane.f32.xlu0 %v553_v57 }
 0x5c8   :  { %v530_v59 = vpop.xlane.xlu0 %529 }
 0x5c9   :  { %v2412_v60 = vmul.f32 0.125, %v530_v59 }
 0x5ca   :  { %v533_v61 = vpop.xlane.xlu1 %532 }
 0x5cb   :  { %v588_v62 = vsub.f32 %v2384_v39, %v2412_v60  ;;  %v2416_v63 = vmul.f32 0.125, %v533_v61  ;;  %v564_v12 = vmul.f32 %v2412_v60, %v2412_v60 }
 0x5cc   :  { %v539_v0 = vpop.xlane.xlu0 %538 }
 0x5cd   :  { %v2418_v3 = vmul.f32 0.125, %v539_v0  ;;  %v589_v4 = vsub.f32 %v2390_v31, %v2416_v63  ;;  %v565_v8 = vmul.f32 %v2416_v63, %v2416_v63 }
 0x5ce   :  { %v536_v5 = vpop.xlane.xlu1 %535 }
 0x5cf   :  { %v591_v6 = vsub.f32 %v2386_v7, %v2418_v3  ;;  %v2424_v9 = vmul.f32 0.125, %v536_v5  ;;  %v567_v33 = vmul.f32 %v2418_v3, %v2418_v3 }
 0x5d0   :  { %v546_v11 = vpop.xlane.xlu0 %545 }
 0x5d1   :  { %v560_v15 = vmul.f32 0.125, %v546_v11  ;;  %v590_v17 = vsub.f32 %v2382_v38, %v2424_v9  ;;  %v566_v23 = vmul.f32 %v2424_v9, %v2424_v9 }
 0x5d2   :  { %v552_v18 = vpop.xlane.xlu1 %551 }
 0x5d3   :  { %v568_v10 = vsub.f32 %v560_v15, %v564_v12  ;;  %v562_v22 = vmul.f32 0.125, %v552_v18 }
 0x5d4   :  { %v549_v19 = vpop.xlane.xlu0 %548 }
 0x5d5   :  { %v572_v20 = vmax.f32 %v568_v10, 0.0  ;;  %v561_v14 = vmul.f32 0.125, %v549_v19  ;;  %v570_v30 = vsub.f32 %v562_v22, %v566_v23 }
 0x5d7   :  { %v576_v25 = vadd.f32 1e-05, %v572_v20  ;;  %v569_v26 = vsub.f32 %v561_v14, %v565_v8  ;;  %v574_v13 = vmax.f32 %v570_v30, 0.0 }
 0x5d8   :  { %v555_v27 = vpop.xlane.xlu0 %554 }
 0x5d9   :  { %2014 = vrsqrt.f32 %v576_v25  ;;  %v573_v29 = vmax.f32 %v569_v26, 0.0  ;;  %v563_v32 = vmul.f32 0.125, %v555_v27  ;;  %v578_v34 = vadd.f32 1e-05, %v574_v13 }
 0x5db   :  { %v577_v52 = vadd.f32 1e-05, %v573_v29  ;;  %v571_v16 = vsub.f32 %v563_v32, %v567_v33  ;;  %v1973_v29 = vld [vmem:[%s2935_s3 + $0x18] sm:$0xff]  }
 0x5dd   :  { %2016 = vrsqrt.f32 %v577_v52  ;;  %v575_v35 = vmax.f32 %v571_v16, 0.0 }
 0x5de   :  { %2018 = vrsqrt.f32 %v578_v34 }
 0x5df   :  { %v579_v39 = vadd.f32 1e-05, %v575_v35 }
 0x5e1   :  { %2020 = vrsqrt.f32 %v579_v39 }
 0x5e3   :  { %v2015_v36 = vpop.eup %2014 }
 0x5e4   :  { %v584_v37 = vmul.f32 %v2015_v36, %v2323_v1 }
 0x5e6   :  { %594 = vperm.xlu1 %1938, %v584_v37  }
 0x5e7   :  { %v2017_v28 = vpop.eup %2016 }
 0x5e8   :  { %v585_v31 = vmul.f32 %v2017_v28, %v2330_v2  ;;  %v2019_v43 = vpop.eup %2018 }
 0x5e9   :  { %v586_v44 = vmul.f32 %v2019_v43, %v2357_v47 }
 0x5ea   :  { %1940 = vset.pattern.permute.xlu1 %v2137_v42  ;;  %599 = vperm.xlu0 %1939, %v585_v31  }
 0x5eb   :  { %617 = vperm.xlu1 %1940, %v2323_v1   ;;  %v2021_v48 = vpop.eup %2020  ;;  %v1972_v1 = vld [vmem:[%s2935_s3 + $0x10] sm:$0xff]  }
 0x5ec   :  { %v587_v49 = vmul.f32 %v2021_v48, %v2366_v54  ;;  %1877 = vmatprep.mubr.msk.bf16.mxu1 %vm273_vm2, %v1972_v1  ;;  %v2510_v1 = vld [vmem:[%s2937_s5 + $0x20] sm:$0xff] }
 0x5ee   :  { %1943 = vset.pattern.permute.xlu0 %v2135_v24 }
 0x5ef   :  { %621 = vperm.xlu1 %1940, %v2330_v2  }
 0x5f3   :  { %1941 = vset.pattern.permute.xlu1 %v2136_v58 }
 0x5f4   :  { %604 = vperm.xlu1 %1941, %v586_v44  }
 0x5f8   :  { %609 = vperm.xlu1 %1941, %v587_v49  }
 0x5fc   :  { %1942 = vset.pattern.permute.xlu1 %v2137_v42 }
 0x5fd   :  { %625 = vperm.xlu1 %1942, %v2357_v47  }
 0x601   :  { %629 = vperm.xlu1 %1942, %v2366_v54  }
 0x605   :  { %1944 = vset.pattern.permute.xlu1 %v2134_v21 }
 0x665   :  { %v595_v2 = vpop.permute.xlu1 %594 }
 0x666   :  { %v612_v50 = vmul.f32 %v595_v2, %v588_v62  ;;  %v2516_v2 = vld [vmem:[%s2937_s5 + $0x28] sm:$0xff] }
 0x669   :  { %v600_v51 = vpop.permute.xlu0 %599 }
 0x66a   :  { %v618_v53 = vpop.permute.xlu1 %617  ;;  %v613_v56 = vmul.f32 %v600_v51, %v589_v4 }
 0x66b   :  { %v632_v55 = vadd.f32 %v618_v53, %v612_v50 }
 0x66d   :  { %v636_v57 = vadd.f32 %v632_v55, %v2276_v40 }
 0x66e   :  { %v622_v59 = vpop.permute.xlu1 %621 }
 0x66f   :  { %v644_v47 = vmul.f32 0.70710677, %v636_v57  ;;  %v633_v60 = vadd.f32 %v622_v59, %v613_v56 }
 0x671   :  { %2022 = verf.f32 %v644_v47  ;;  %v637_v54 = vadd.f32 %v633_v60, %v2278_v41  ;;  %v640_v41 = vmul.f32 0.5, %v636_v57 }
 0x673   :  { %v645_v61 = vmul.f32 0.70710677, %v637_v54  ;;  %v605_v63 = vpop.permute.xlu1 %604  ;;  %v641_v10 = vmul.f32 0.5, %v637_v54 }
 0x674   :  { %v614_v62 = vmul.f32 %v605_v63, %v590_v17 }
 0x675   :  { %2024 = verf.f32 %v645_v61 }
 0x677   :  { %v610_v0 = vpop.permute.xlu1 %609 }
 0x678   :  { %v615_v40 = vmul.f32 %v610_v0, %v591_v6 }
 0x67b   :  { %v2023_v5 = vpop.eup %2022 }
 0x67c   :  { %v626_v11 = vpop.permute.xlu1 %625  ;;  %v652_v4 = vadd.f32 1.0, %v2023_v5 }
 0x67d   :  { %v634_v12 = vadd.f32 %v626_v11, %v614_v62 }
 0x67e   :  { %v2462_v14 = vmul.f32 %v652_v4, %v640_v41 }
 0x67f   :  { %v2025_v15 = vpop.eup %2024  ;;  %v638_v18 = vadd.f32 %v634_v12, %v2282_v45 }
 0x680   :  { %v630_v19 = vpop.permute.xlu1 %629  ;;  %v653_v8 = vadd.f32 1.0, %v2025_v15 }
 0x681   :  { %v646_v20 = vmul.f32 0.70710677, %v638_v18  ;;  %v635_v22 = vadd.f32 %v630_v19, %v615_v40  ;;  %v642_v23 = vmul.f32 0.5, %v638_v18 }
 0x682   :  { %v2464_v38 = vmul.f32 %v653_v8, %v641_v10 }
 0x683   :  { %2026 = verf.f32 %v646_v20  ;;  %v639_v9 = vadd.f32 %v635_v22, %v2284_v46 }
 0x684   :  { %v675_v17 = vpack.c.bf16 %v2464_v38, %v2462_v14 }
 0x685   :  { %v647_v7 = vmul.f32 0.70710677, %v639_v9  ;;  %v643_v25 = vmul.f32 0.5, %v639_v9 }
 0x686   :  { %1873 = vmatprep.subr.bf16.mxu1 %v675_v17 }
 0x687   :  { %2028 = verf.f32 %v647_v7  ;;  %1874 = vmatpush3.bf16.msra.mxu1 %v675_v17 }
 0x68d   :  { %v2027_v45 = vpop.eup %2026 }
 0x68e   :  { %v654_v3 = vadd.f32 1.0, %v2027_v45 }
 0x690   :  { %v2469_v27 = vmul.f32 %v654_v3, %v642_v23 }
 0x691   :  { %v2029_v6 = vpop.eup %2028 }
 0x692   :  { %v655_v26 = vadd.f32 1.0, %v2029_v6 }
 0x694   :  { %v2471_v30 = vmul.f32 %v655_v26, %v643_v25 }
 0x696   :  { %v676_v46 = vpack.c.bf16 %v2471_v30, %v2469_v27 }
 0x698   :  { %1875 = vmatprep.subr.bf16.mxu1 %v676_v46 }
 0x699   :  { %1876 = vmatpush3.bf16.msra.mxu1 %v676_v46 }
 0x69c   :  { %1878 = vmatmul.mubr.msk.bf16.vlgmr.msra.gmra.mrb[4].mxu1 %vm273_vm2, %v1973_v29 }
 0x76f   :  { %v2479_v32 = vpop.f32.mrb[4].mxu1 }
 0x770   :  { %v2481_v33 = vpop.f32.mrb[5].mxu1  ;;  %v748_v52 = vsel %vm116_vm1, %v2479_v32, 0.0  ;;  %v756_v31 = vmul.f32 %v2479_v32, %v2479_v32 }
 0x771   :  { %749 = vadd.xlane.f32.xlu0 %v748_v52  ;;  %v2485_v13 = vpop.f32.mrb[6].mxu1  ;;  %v742_v16 = vsel %vm116_vm1, %v2481_v33, 0.0  ;;  %v754_v36 = vmul.f32 %v2481_v33, %v2481_v33 }
 0x772   :  { %743 = vadd.xlane.f32.xlu1 %v742_v16  ;;  %v2489_v34 = vpop.f32.mrb[7].mxu1  ;;  %v751_v37 = vsel %vm116_vm1, %v2485_v13, 0.0  ;;  %v757_v44 = vmul.f32 %v2485_v13, %v2485_v13  ;;  %v764_v48 = vsel %vm116_vm1, %v756_v31, 0.0 }
 0x773   :  { %v745_v35 = vsel %vm116_vm1, %v2489_v34, 0.0  ;;  %v755_v39 = vmul.f32 %v2489_v34, %v2489_v34  ;;  %v758_v28 = vsel %vm116_vm1, %v754_v36, 0.0 }
 0x774   :  { %v767_v49 = vsel %vm116_vm1, %v757_v44, 0.0 }
 0x775   :  { %746 = vadd.xlane.f32.xlu0 %v745_v35  ;;  %v761_v43 = vsel %vm116_vm1, %v755_v39, 0.0  ;;  %v2549_v35 = vld [vmem:[%s2937_s5 + $0x38] sm:$0xff] }
 0x776   :  { %752 = vadd.xlane.f32.xlu1 %v751_v37 }
 0x779   :  { %759 = vadd.xlane.f32.xlu0 %v758_v28  ;;  %v1974_v28 = vld [vmem:[%s2936_s4 + $0x10] sm:$0xff]  }
 0x77a   :  { %762 = vadd.xlane.f32.xlu1 %v761_v43  ;;  %1885 = vmatprep.mubr.msk.bf16.mxu0 %vm273_vm2, %v1974_v28 }
 0x77d   :  { %765 = vadd.xlane.f32.xlu0 %v764_v48 }
 0x77e   :  { %768 = vadd.xlane.f32.xlu1 %v767_v49 }
 0x78f   :  { %832 = vperm.xlu1 %1944, %v2510_v1  }
 0x793   :  { %837 = vperm.xlu1 %1944, %v2516_v2  }
 0x797   :  { %1945 = vset.pattern.permute.xlu1 %v2135_v24 }
 0x7fe   :  { %v750_v50 = vpop.xlane.xlu0 %749 }
 0x7ff   :  { %v2520_v51 = vmul.f32 0.125, %v750_v50  ;;  %v744_v53 = vpop.xlane.xlu1 %743 }
 0x800   :  { %v770_v55 = vmul.f32 0.125, %v744_v53 }
 0x801   :  { %v804_v56 = vsub.f32 %v2479_v32, %v2520_v51  ;;  %v780_v40 = vmul.f32 %v2520_v51, %v2520_v51 }
 0x802   :  { %v747_v57 = vpop.xlane.xlu0 %746  ;;  %v802_v59 = vsub.f32 %v2481_v33, %v770_v55  ;;  %v778_v5 = vmul.f32 %v770_v55, %v770_v55  ;;  %v2543_v33 = vld [vmem:[%s2937_s5 + $0x30] sm:$0xff] }
 0x803   :  { %v2525_v47 = vmul.f32 0.125, %v747_v57  ;;  %v753_v60 = vpop.xlane.xlu1 %752 }
 0x804   :  { %v2527_v54 = vmul.f32 0.125, %v753_v60 }
 0x805   :  { %v803_v61 = vsub.f32 %v2489_v34, %v2525_v47  ;;  %v779_v18 = vmul.f32 %v2525_v47, %v2525_v47 }
 0x806   :  { %v760_v63 = vpop.xlane.xlu0 %759  ;;  %v805_v0 = vsub.f32 %v2485_v13, %v2527_v54  ;;  %v781_v8 = vmul.f32 %v2527_v54, %v2527_v54 }
 0x807   :  { %v774_v62 = vmul.f32 0.125, %v760_v63  ;;  %v763_v11 = vpop.xlane.xlu1 %762 }
 0x808   :  { %v775_v4 = vmul.f32 0.125, %v763_v11 }
 0x809   :  { %v782_v12 = vsub.f32 %v774_v62, %v778_v5 }
 0x80a   :  { %v766_v15 = vpop.xlane.xlu0 %765  ;;  %v783_v9 = vsub.f32 %v775_v4, %v779_v18 }
 0x80b   :  { %v786_v41 = vmax.f32 %v782_v12, 0.0  ;;  %v776_v10 = vmul.f32 0.125, %v766_v15  ;;  %v769_v19 = vpop.xlane.xlu1 %768 }
 0x80c   :  { %v777_v20 = vmul.f32 0.125, %v769_v19  ;;  %v787_v6 = vmax.f32 %v783_v9, 0.0 }
 0x80d   :  { %v790_v22 = vadd.f32 1e-05, %v786_v41  ;;  %v784_v17 = vsub.f32 %v776_v10, %v780_v40 }
 0x80e   :  { %v785_v7 = vsub.f32 %v777_v20, %v781_v8  ;;  %v791_v26 = vadd.f32 1e-05, %v787_v6 }
 0x80f   :  { %2030 = vrsqrt.f32 %v790_v22  ;;  %v788_v45 = vmax.f32 %v784_v17, 0.0  ;;  %v833_v31 = vpop.permute.xlu1 %832 }
 0x810   :  { %v789_v3 = vmax.f32 %v785_v7, 0.0 }
 0x811   :  { %v792_v23 = vadd.f32 1e-05, %v788_v45 }
 0x812   :  { %v793_v25 = vadd.f32 1e-05, %v789_v3  ;;  %v1975_v3 = vld [vmem:[%s2936_s4 + $0x18] sm:$0xff]  }
 0x813   :  { %2032 = vrsqrt.f32 %v792_v23  ;;  %v838_v43 = vpop.permute.xlu1 %837 }
 0x814   :  { %2034 = vrsqrt.f32 %v793_v25 }
 0x815   :  { %2036 = vrsqrt.f32 %v791_v26 }
 0x819   :  { %v2031_v46 = vpop.eup %2030 }
 0x81a   :  { %v798_v29 = vmul.f32 %v2031_v46, %v2510_v1 }
 0x81c   :  { %808 = vperm.xlu0 %1943, %v798_v29  }
 0x81d   :  { %v2033_v52 = vpop.eup %2032 }
 0x81e   :  { %v800_v16 = vmul.f32 %v2033_v52, %v2543_v33  ;;  %v2035_v34 = vpop.eup %2034 }
 0x81f   :  { %v801_v36 = vmul.f32 %v2035_v34, %v2549_v35  ;;  %v2037_v37 = vpop.eup %2036 }
 0x820   :  { %818 = vperm.xlu1 %1945, %v800_v16   ;;  %1947 = vset.pattern.permute.xlu0 %v2136_v58  ;;  %v799_v39 = vmul.f32 %v2037_v37, %v2516_v2 }
 0x824   :  { %823 = vperm.xlu1 %1945, %v801_v36  }
 0x828   :  { %813 = vperm.xlu1 %1945, %v799_v39  }
 0x82c   :  { %1946 = vset.pattern.permute.xlu1 %v2134_v21 }
 0x82d   :  { %842 = vperm.xlu1 %1946, %v2543_v33  }
 0x831   :  { %847 = vperm.xlu1 %1946, %v2549_v35  }
 0x835   :  { %1948 = vset.pattern.permute.xlu1 %v2137_v42 }
 0x89b   :  { %v809_v44 = vpop.permute.xlu0 %808 }
 0x89c   :  { %v826_v48 = vmul.f32 %v809_v44, %v802_v59 }
 0x89e   :  { %v850_v50 = vadd.f32 %v833_v31, %v826_v48 }
 0x89f   :  { %v819_v49 = vpop.permute.xlu1 %818 }
 0x8a0   :  { %v858_v55 = vmul.f32 0.70710677, %v850_v50  ;;  %v828_v63 = vmul.f32 %v819_v49, %v804_v56  ;;  %v854_v10 = vmul.f32 0.5, %v850_v50 }
 0x8a2   :  { %2038 = verf.f32 %v858_v55 }
 0x8a3   :  { %v824_v53 = vpop.permute.xlu1 %823 }
 0x8a4   :  { %v829_v59 = vmul.f32 %v824_v53, %v805_v0 }
 0x8a7   :  { %v814_v57 = vpop.permute.xlu1 %813 }
 0x8a8   :  { %v827_v47 = vmul.f32 %v814_v57, %v803_v61 }
 0x8aa   :  { %v851_v60 = vadd.f32 %v838_v43, %v827_v47 }
 0x8ac   :  { %v859_v5 = vmul.f32 0.70710677, %v851_v60  ;;  %v843_v62 = vpop.permute.xlu1 %842  ;;  %v2039_v61 = vpop.eup %2038  ;;  %v855_v32 = vmul.f32 0.5, %v851_v60 }
 0x8ad   :  { %v852_v11 = vadd.f32 %v843_v62, %v828_v63  ;;  %v866_v18 = vadd.f32 1.0, %v2039_v61 }
 0x8ae   :  { %2040 = verf.f32 %v859_v5 }
 0x8af   :  { %v860_v12 = vmul.f32 0.70710677, %v852_v11  ;;  %v870_v19 = vmul.f32 %v866_v18, %v854_v10  ;;  %v856_v13 = vmul.f32 0.5, %v852_v11 }
 0x8b0   :  { %v848_v4 = vpop.permute.xlu1 %847 }
 0x8b1   :  { %2042 = verf.f32 %v860_v12  ;;  %v853_v15 = vadd.f32 %v848_v4, %v829_v59 }
 0x8b3   :  { %v861_v40 = vmul.f32 0.70710677, %v853_v15  ;;  %v857_v54 = vmul.f32 0.5, %v853_v15 }
 0x8b5   :  { %2044 = verf.f32 %v861_v40 }
 0x8b8   :  { %v2041_v41 = vpop.eup %2040 }
 0x8b9   :  { %v867_v51 = vadd.f32 1.0, %v2041_v41 }
 0x8bb   :  { %v2043_v56 = vpop.eup %2042  ;;  %v871_v8 = vmul.f32 %v867_v51, %v855_v32 }
 0x8bc   :  { %v868_v22 = vadd.f32 1.0, %v2043_v56 }
 0x8bd   :  { %v874_v20 = vpack.c.bf16 %v871_v8, %v870_v19 }
 0x8be   :  { %v872_v17 = vmul.f32 %v868_v22, %v856_v13 }
 0x8bf   :  { %v2045_v9 = vpop.eup %2044  ;;  %1881 = vmatprep.subr.bf16.mxu0 %v874_v20 }
 0x8c0   :  { %v869_v0 = vadd.f32 1.0, %v2045_v9  ;;  %1882 = vmatpush3.bf16.msra.mxu0 %v874_v20 }
 0x8c2   :  { %v873_v7 = vmul.f32 %v869_v0, %v857_v54 }
 0x8c4   :  { %v875_v45 = vpack.c.bf16 %v873_v7, %v872_v17 }
 0x8c6   :  { %1883 = vmatprep.subr.bf16.mxu0 %v875_v45 }
 0x8c7   :  { %1884 = vmatpush3.bf16.msra.mxu0 %v875_v45 }
 0x8ca   :  { %1886 = vmatmul.mubr.msk.bf16.vlgmr.msra.gmra.mrb[8].mxu0 %vm273_vm2, %v1975_v3 }
 0x99d   :  { %v2572_v6 = vpop.f32.mrb[8].mxu0 }
 0x99e   :  { %v2574_v23 = vpop.f32.mrb[9].mxu0  ;;  %v947_v25 = vsel %vm116_vm1, %v2572_v6, 0.0  ;;  %v955_v39 = vmul.f32 %v2572_v6, %v2572_v6 }
 0x99f   :  { %948 = vadd.xlane.f32.xlu0 %v947_v25  ;;  %v2578_v26 = vpop.f32.mrb[10].mxu0  ;;  %v941_v46 = vsel %vm116_vm1, %v2574_v23, 0.0  ;;  %v953_v16 = vmul.f32 %v2574_v23, %v2574_v23 }
 0x9a0   :  { %942 = vadd.xlane.f32.xlu1 %v941_v46  ;;  %v2582_v29 = vpop.f32.mrb[11].mxu0  ;;  %v950_v34 = vsel %vm116_vm1, %v2578_v26, 0.0  ;;  %v956_v31 = vmul.f32 %v2578_v26, %v2578_v26  ;;  %v963_v43 = vsel %vm116_vm1, %v955_v39, 0.0 }
 0x9a1   :  { %v944_v52 = vsel %vm116_vm1, %v2582_v29, 0.0  ;;  %v954_v36 = vmul.f32 %v2582_v29, %v2582_v29  ;;  %v957_v37 = vsel %vm116_vm1, %v953_v16, 0.0 }
 0x9a2   :  { %v966_v44 = vsel %vm116_vm1, %v956_v31, 0.0 }
 0x9a3   :  { %945 = vadd.xlane.f32.xlu0 %v944_v52  ;;  %v960_v28 = vsel %vm116_vm1, %v954_v36, 0.0 }
 0x9a4   :  { %951 = vadd.xlane.f32.xlu1 %v950_v34 }
 0x9a7   :  { %958 = vadd.xlane.f32.xlu0 %v957_v37 }
 0x9a8   :  { %961 = vadd.xlane.f32.xlu1 %v960_v28 }
 0x9ab   :  { %964 = vadd.xlane.f32.xlu0 %v963_v43 }
 0x9ac   :  { %967 = vadd.xlane.f32.xlu1 %v966_v44 }
 0x9bd   :  { %1030 = vperm.xlu1 %1948, %v2510_v1  }
 0x9c1   :  { %1034 = vperm.xlu1 %1948, %v2516_v2  }
 0x9c5   :  { %1949 = vset.pattern.permute.xlu1 %v2136_v58 }
 0xa2c   :  { %v949_v48 = vpop.xlane.xlu0 %948 }
 0xa2d   :  { %v2603_v49 = vmul.f32 0.125, %v949_v48  ;;  %v943_v50 = vpop.xlane.xlu1 %942 }
 0xa2e   :  { %v969_v53 = vmul.f32 0.125, %v943_v50 }
 0xa2f   :  { %v1003_v55 = vsub.f32 %v2572_v6, %v2603_v49  ;;  %v979_v41 = vmul.f32 %v2603_v49, %v2603_v49 }
 0xa30   :  { %v946_v57 = vpop.xlane.xlu0 %945  ;;  %v1001_v47 = vsub.f32 %v2574_v23, %v969_v53  ;;  %v977_v12 = vmul.f32 %v969_v53, %v969_v53 }
 0xa31   :  { %v2608_v60 = vmul.f32 0.125, %v946_v57  ;;  %v952_v63 = vpop.xlane.xlu1 %951 }
 0xa32   :  { %v2610_v5 = vmul.f32 0.125, %v952_v63 }
 0xa33   :  { %v1002_v62 = vsub.f32 %v2582_v29, %v2608_v60  ;;  %v978_v10 = vmul.f32 %v2608_v60, %v2608_v60 }
 0xa34   :  { %v959_v11 = vpop.xlane.xlu0 %958  ;;  %v1004_v59 = vsub.f32 %v2578_v26, %v2610_v5  ;;  %v980_v19 = vmul.f32 %v2610_v5, %v2610_v5 }
 0xa35   :  { %v973_v4 = vmul.f32 0.125, %v959_v11  ;;  %v962_v15 = vpop.xlane.xlu1 %961 }
 0xa36   :  { %v974_v61 = vmul.f32 0.125, %v962_v15 }
 0xa37   :  { %v981_v40 = vsub.f32 %v973_v4, %v977_v12 }
 0xa38   :  { %v965_v18 = vpop.xlane.xlu0 %964  ;;  %v982_v22 = vsub.f32 %v974_v61, %v978_v10 }
 0xa39   :  { %v985_v32 = vmax.f32 %v981_v40, 0.0  ;;  %v975_v51 = vmul.f32 0.125, %v965_v18  ;;  %v968_v56 = vpop.xlane.xlu1 %967 }
 0xa3a   :  { %v976_v8 = vmul.f32 0.125, %v968_v56  ;;  %v986_v17 = vmax.f32 %v982_v22, 0.0  ;;  %v1977_v22 = vld [vmem:[%s2935_s3 + $0x28] sm:$0xff]  }
 0xa3b   :  { %v989_v20 = vadd.f32 1e-05, %v985_v32  ;;  %v983_v9 = vsub.f32 %v975_v51, %v979_v41 }
 0xa3c   :  { %v984_v13 = vsub.f32 %v976_v8, %v980_v19  ;;  %v990_v3 = vadd.f32 1e-05, %v986_v17 }
 0xa3d   :  { %2046 = vrsqrt.f32 %v989_v20  ;;  %v987_v54 = vmax.f32 %v983_v9, 0.0  ;;  %v1031_v37 = vpop.permute.xlu1 %1030 }
 0xa3e   :  { %v988_v0 = vmax.f32 %v984_v13, 0.0 }
 0xa3f   :  { %v991_v7 = vadd.f32 1e-05, %v987_v54 }
 0xa40   :  { %v992_v45 = vadd.f32 1e-05, %v988_v0 }
 0xa41   :  { %2048 = vrsqrt.f32 %v991_v7  ;;  %v1035_v39 = vpop.permute.xlu1 %1034 }
 0xa42   :  { %2050 = vrsqrt.f32 %v992_v45 }
 0xa43   :  { %2052 = vrsqrt.f32 %v990_v3 }
 0xa47   :  { %v2047_v23 = vpop.eup %2046 }
 0xa48   :  { %v997_v25 = vmul.f32 %v2047_v23, %v2510_v1  ;;  %v1976_v1 = vld [vmem:[%s2935_s3 + $0x20] sm:$0xff]   ;;  %s1752_s3 = sshll.u32 %s2140_s16, 4  ;;  %s1753_s3 = int_to_ptr.vmem [resolvable:$true] %s1752_s3 }
 0xa49   :  { %1893 = vmatprep.mubr.msk.bf16.mxu1 %vm273_vm2, %v1976_v1  ;;  %s2110_s17 = scalar_lea.vmem %s1753_s3, 128  ;;  %p2115_p1 = scmp.lt.s32.totalorder %s1753_s3, %s1753_s3 }
 0xa4a   :  { %1007 = vperm.xlu0 %1947, %v997_v25   ;;  %p2111_p0 = scmp.ne.s32.totalorder %s1753_s3, %s2110_s17  ;;  %p2116_p2 = scmp.lt.s32.totalorder %s2110_s17, %s2110_s17 }
 0xa4b   :  { %v2049_v46 = vpop.eup %2048 }
 0xa4c   :  { %v999_v29 = vmul.f32 %v2049_v46, %v2543_v33  ;;  %v2051_v52 = vpop.eup %2050  ;;  %p2117_p3 = por %p2116_p2, %p2115_p1 }
 0xa4d   :  { %v1000_v16 = vmul.f32 %v2051_v52, %v2549_v35  ;;  %v2053_v34 = vpop.eup %2052 }
 0xa4e   :  { %1017 = vperm.xlu1 %1949, %v999_v29   ;;  %1952 = vset.pattern.permute.xlu0 %v2135_v24  ;;  %v998_v36 = vmul.f32 %v2053_v34, %v2516_v2  ;;  %p2118_p4 = pnand %p2117_p3, %p2111_p0 }
 0xa52   :  { %1022 = vperm.xlu1 %1949, %v1000_v16  }
 0xa56   :  { %1012 = vperm.xlu1 %1949, %v998_v36  }
 0xa5a   :  { %1950 = vset.pattern.permute.xlu1 %v2137_v42 }
 0xa5b   :  { %1038 = vperm.xlu1 %1950, %v2543_v33  }
 0xa5f   :  { %1042 = vperm.xlu1 %1950, %v2549_v35  }
 0xa63   :  { %1951 = vset.pattern.permute.xlu1 %v2135_v24 }
 0xac9   :  { %v1008_v28 = vpop.permute.xlu0 %1007 }
 0xaca   :  { %v1025_v31 = vmul.f32 %v1008_v28, %v1001_v47 }
 0xacc   :  { %v1045_v43 = vadd.f32 %v1031_v37, %v1025_v31 }
 0xacd   :  { %v1018_v2 = vpop.permute.xlu1 %1017 }
 0xace   :  { %v1049_v48 = vadd.f32 %v1045_v43, %v2462_v14  ;;  %v1027_v57 = vmul.f32 %v1018_v2, %v1003_v55 }
 0xad0   :  { %v1057_v50 = vmul.f32 0.70710677, %v1049_v48  ;;  %v1053_v61 = vmul.f32 0.5, %v1049_v48 }
 0xad1   :  { %v1023_v44 = vpop.permute.xlu1 %1022 }
 0xad2   :  { %2054 = verf.f32 %v1057_v50  ;;  %v1028_v47 = vmul.f32 %v1023_v44, %v1004_v59 }
 0xad5   :  { %v1013_v33 = vpop.permute.xlu1 %1012 }
 0xad6   :  { %v1026_v35 = vmul.f32 %v1013_v33, %v1002_v62 }
 0xad8   :  { %v1046_v53 = vadd.f32 %v1035_v39, %v1026_v35 }
 0xada   :  { %v1050_v60 = vadd.f32 %v1046_v53, %v2464_v38  ;;  %v1039_v63 = vpop.permute.xlu1 %1038 }
 0xadb   :  { %v1047_v11 = vadd.f32 %v1039_v63, %v1027_v57 }
 0xadc   :  { %v1058_v12 = vmul.f32 0.70710677, %v1050_v60  ;;  %v2055_v55 = vpop.eup %2054  ;;  %v1054_v18 = vmul.f32 0.5, %v1050_v60 }
 0xadd   :  { %v1051_v14 = vadd.f32 %v1047_v11, %v2469_v27  ;;  %v1065_v38 = vadd.f32 1.0, %v2055_v55 }
 0xade   :  { %2056 = verf.f32 %v1058_v12  ;;  %v1043_v4 = vpop.permute.xlu1 %1042 }
 0xadf   :  { %v1059_v62 = vmul.f32 0.70710677, %v1051_v14  ;;  %v1048_v15 = vadd.f32 %v1043_v4, %v1028_v47  ;;  %v2645_v26 = vmul.f32 %v1065_v38, %v1053_v61 }
 0xae1   :  { %2058 = verf.f32 %v1059_v62  ;;  %v1052_v6 = vadd.f32 %v1048_v15, %v2471_v30  ;;  %v1055_v30 = vmul.f32 0.5, %v1051_v14 }
 0xae3   :  { %v1060_v49 = vmul.f32 0.70710677, %v1052_v6  ;;  %v1056_v51 = vmul.f32 0.5, %v1052_v6 }
 0xae5   :  { %2060 = verf.f32 %v1060_v49 }
 0xae8   :  { %v2057_v40 = vpop.eup %2056 }
 0xae9   :  { %v1066_v41 = vadd.f32 1.0, %v2057_v40 }
 0xaeb   :  { %v2059_v10 = vpop.eup %2058  ;;  %v2647_v5 = vmul.f32 %v1066_v41, %v1054_v18 }
 0xaec   :  { %v1067_v59 = vadd.f32 1.0, %v2059_v10 }
 0xaed   :  { %v1088_v27 = vpack.c.bf16 %v2647_v5, %v2645_v26 }
 0xaee   :  { %v2651_v19 = vmul.f32 %v1067_v59, %v1055_v30  ;;  %v2716_v30 = vld [vmem:[%s2937_s5 + $0x40] sm:$0xff] }
 0xaef   :  { %v2061_v32 = vpop.eup %2060  ;;  %1889 = vmatprep.subr.bf16.mxu1 %v1088_v27 }
 0xaf0   :  { %v1068_v56 = vadd.f32 1.0, %v2061_v32  ;;  %1890 = vmatpush3.bf16.msra.mxu1 %v1088_v27 }
 0xaf2   :  { %v2653_v8 = vmul.f32 %v1068_v56, %v1056_v51 }
 0xaf4   :  { %v1089_v20 = vpack.c.bf16 %v2653_v8, %v2651_v19 }
 0xaf6   :  { %1891 = vmatprep.subr.bf16.mxu1 %v1089_v20 }
 0xaf7   :  { %1892 = vmatpush3.bf16.msra.mxu1 %v1089_v20 }
 0xafa   :  { %1894 = vmatmul.mubr.msk.bf16.vlgmr.msra.gmra.mrb[8].mxu1 %vm273_vm2, %v1977_v22  ;;  %v2722_v22 = vld [vmem:[%s2937_s5 + $0x48] sm:$0xff] }
 0xbcd   :  { %v2661_v9 = vpop.f32.mrb[8].mxu1 }
 0xbce   :  { %v2663_v13 = vpop.f32.mrb[9].mxu1  ;;  %v1169_v45 = vmul.f32 %v2661_v9, %v2661_v9  ;;  %v1161_v3 = vsel %vm116_vm1, %v2661_v9, 0.0 }
 0xbcf   :  { %v2665_v54 = vpop.f32.mrb[10].mxu1  ;;  %v1155_v0 = vsel %vm116_vm1, %v2663_v13, 0.0  ;;  %v1167_v25 = vmul.f32 %v2663_v13, %v2663_v13 }
 0xbd0   :  { %1156 = vadd.xlane.f32.xlu1 %v1155_v0  ;;  %v2669_v17 = vpop.f32.mrb[11].mxu1  ;;  %v1164_v7 = vsel %vm116_vm1, %v2665_v54, 0.0  ;;  %v1177_v46 = vsel %vm116_vm1, %v1169_v45, 0.0  ;;  %v1170_v34 = vmul.f32 %v2665_v54, %v2665_v54  ;;  %v2732_v45 = vld [vmem:[%s2937_s5 + $0x50] sm:$0xff] }
 0xbd1   :  { %1165 = vadd.xlane.f32.xlu0 %v1164_v7  ;;  %v1158_v23 = vsel %vm116_vm1, %v2669_v17, 0.0  ;;  %v1171_v29 = vsel %vm116_vm1, %v1167_v25, 0.0  ;;  %v1168_v52 = vmul.f32 %v2669_v17, %v2669_v17  ;;  %v2739_v25 = vld [vmem:[%s2937_s5 + $0x58] sm:$0xff] }
 0xbd2   :  { %v1180_v36 = vsel %vm116_vm1, %v1170_v34, 0.0 }
 0xbd3   :  { %v1174_v16 = vsel %vm116_vm1, %v1168_v52, 0.0 }
 0xbd4   :  { %1162 = vadd.xlane.f32.xlu1 %v1161_v3 }
 0xbd5   :  { %1159 = vadd.xlane.f32.xlu0 %v1158_v23 }
 0xbd8   :  { %1178 = vadd.xlane.f32.xlu1 %v1177_v46 }
 0xbd9   :  { %1172 = vadd.xlane.f32.xlu0 %v1171_v29  ;;  %v1978_v29 = vld [vmem:[%s2936_s4 + $0x20] sm:$0xff]  }
 0xbda   :  { %1901 = vmatprep.mubr.msk.bf16.mxu0 %vm273_vm2, %v1978_v29 }
 0xbdd   :  { %1175 = vadd.xlane.f32.xlu0 %v1174_v16 }
 0xbe1   :  { %1181 = vadd.xlane.f32.xlu0 %v1180_v36 }
 0xc5d   :  { %v1157_v1 = vpop.xlane.xlu1 %1156 }
 0xc5e   :  { %v2689_v37 = vmul.f32 0.125, %v1157_v1  ;;  %v1166_v39 = vpop.xlane.xlu0 %1165 }
 0xc5f   :  { %v2691_v28 = vmul.f32 0.125, %v1166_v39 }
 0xc60   :  { %v1215_v31 = vsub.f32 %v2663_v13, %v2689_v37  ;;  %v1191_v57 = vmul.f32 %v2689_v37, %v2689_v37 }
 0xc61   :  { %v1163_v2 = vpop.xlane.xlu1 %1162  ;;  %v1218_v43 = vsub.f32 %v2665_v54, %v2691_v28  ;;  %v1194_v18 = vmul.f32 %v2691_v28, %v2691_v28 }
 0xc62   :  { %v2697_v44 = vmul.f32 0.125, %v1163_v2  ;;  %v1160_v48 = vpop.xlane.xlu0 %1159 }
 0xc63   :  { %v2699_v33 = vmul.f32 0.125, %v1160_v48 }
 0xc64   :  { %v1217_v50 = vsub.f32 %v2661_v9, %v2697_v44  ;;  %v1193_v15 = vmul.f32 %v2697_v44, %v2697_v44 }
 0xc65   :  { %v1216_v35 = vsub.f32 %v2669_v17, %v2699_v33  ;;  %v1179_v63 = vpop.xlane.xlu1 %1178  ;;  %v1192_v47 = vmul.f32 %v2699_v33, %v2699_v33 }
 0xc66   :  { %v1173_v53 = vpop.xlane.xlu0 %1172  ;;  %v1189_v14 = vmul.f32 0.125, %v1179_v63 }
 0xc67   :  { %v1187_v60 = vmul.f32 0.125, %v1173_v53 }
 0xc68   :  { %v1197_v38 = vsub.f32 %v1189_v14, %v1193_v15 }
 0xc69   :  { %v1195_v11 = vsub.f32 %v1187_v60, %v1191_v57 }
 0xc6a   :  { %v1176_v12 = vpop.xlane.xlu0 %1175  ;;  %v1201_v10 = vmax.f32 %v1197_v38, 0.0 }
 0xc6b   :  { %v1199_v4 = vmax.f32 %v1195_v11, 0.0  ;;  %v1188_v62 = vmul.f32 0.125, %v1176_v12 }
 0xc6c   :  { %v1205_v59 = vadd.f32 1e-05, %v1201_v10 }
 0xc6d   :  { %v1203_v6 = vadd.f32 1e-05, %v1199_v4  ;;  %v1196_v49 = vsub.f32 %v1188_v62, %v1192_v47 }
 0xc6e   :  { %v1182_v55 = vpop.xlane.xlu0 %1181 }
 0xc6f   :  { %2062 = vrsqrt.f32 %v1203_v6  ;;  %v1200_v40 = vmax.f32 %v1196_v49, 0.0  ;;  %v1190_v61 = vmul.f32 0.125, %v1182_v55 }
 0xc71   :  { %v1204_v41 = vadd.f32 1e-05, %v1200_v40  ;;  %v1198_v27 = vsub.f32 %v1190_v61, %v1194_v18 }
 0xc73   :  { %2064 = vrsqrt.f32 %v1204_v41  ;;  %v1202_v32 = vmax.f32 %v1198_v27, 0.0 }
 0xc74   :  { %2066 = vrsqrt.f32 %v1205_v59 }
 0xc75   :  { %v1206_v20 = vadd.f32 1e-05, %v1202_v32 }
 0xc77   :  { %2068 = vrsqrt.f32 %v1206_v20 }
 0xc79   :  { %v2063_v51 = vpop.eup %2062 }
 0xc7a   :  { %v1211_v56 = vmul.f32 %v2063_v51, %v2716_v30 }
 0xc7c   :  { %1221 = vperm.xlu1 %1951, %v1211_v56  }
 0xc7d   :  { %v2065_v0 = vpop.eup %2064 }
 0xc7e   :  { %v1212_v17 = vmul.f32 %v2065_v0, %v2722_v22  ;;  %v2067_v7 = vpop.eup %2066 }
 0xc7f   :  { %v1213_v3 = vmul.f32 %v2067_v7, %v2732_v45 }
 0xc80   :  { %1953 = vset.pattern.permute.xlu1 %v2134_v21  ;;  %1226 = vperm.xlu0 %1952, %v1212_v17  }
 0xc81   :  { %1245 = vperm.xlu1 %1953, %v2716_v30   ;;  %v2069_v23 = vpop.eup %2068 }
 0xc82   :  { %v1214_v46 = vmul.f32 %v2069_v23, %v2739_v25 }
 0xc84   :  { %1957 = vset.pattern.permute.xlu0 %v2136_v58 }
 0xc85   :  { %1250 = vperm.xlu1 %1953, %v2722_v22  }
 0xc89   :  { %1954 = vset.pattern.permute.xlu1 %v2135_v24 }
 0xc8a   :  { %1231 = vperm.xlu1 %1954, %v1213_v3  }
 0xc8e   :  { %1236 = vperm.xlu1 %1954, %v1214_v46  }
 0xc92   :  { %1955 = vset.pattern.permute.xlu1 %v2134_v21 }
 0xc93   :  { %1255 = vperm.xlu1 %1955, %v2732_v45  }
 0xc97   :  { %1260 = vperm.xlu1 %1955, %v2739_v25  }
 0xc9b   :  { %1956 = vset.pattern.permute.xlu1 %v2136_v58 }
 0xcfb   :  { %v1222_v52 = vpop.permute.xlu1 %1221 }
 0xcfc   :  { %v1239_v16 = vmul.f32 %v1222_v52, %v1215_v31 }
 0xcff   :  { %v1227_v34 = vpop.permute.xlu0 %1226 }
 0xd00   :  { %v1246_v36 = vpop.permute.xlu1 %1245  ;;  %v1240_v39 = vmul.f32 %v1227_v34, %v1216_v35 }
 0xd01   :  { %v1263_v1 = vadd.f32 %v1246_v36, %v1239_v16 }
 0xd03   :  { %v1271_v2 = vmul.f32 0.70710677, %v1263_v1  ;;  %v1267_v47 = vmul.f32 0.5, %v1263_v1 }
 0xd04   :  { %v1251_v48 = vpop.permute.xlu1 %1250 }
 0xd05   :  { %2070 = verf.f32 %v1271_v2  ;;  %v1264_v33 = vadd.f32 %v1251_v48, %v1240_v39 }
 0xd07   :  { %v1272_v53 = vmul.f32 0.70710677, %v1264_v33  ;;  %v1268_v14 = vmul.f32 0.5, %v1264_v33 }
 0xd09   :  { %2072 = verf.f32 %v1272_v53  ;;  %v1232_v57 = vpop.permute.xlu1 %1231 }
 0xd0a   :  { %v1241_v11 = vmul.f32 %v1232_v57, %v1217_v50 }
 0xd0d   :  { %v1237_v60 = vpop.permute.xlu1 %1236 }
 0xd0e   :  { %v1242_v4 = vmul.f32 %v1237_v60, %v1218_v43  ;;  %v1979_v43 = vld [vmem:[%s2936_s4 + $0x28] sm:$0xff]  }
 0xd0f   :  { %v2071_v63 = vpop.eup %2070 }
 0xd10   :  { %v1279_v12 = vadd.f32 1.0, %v2071_v63 }
 0xd12   :  { %v1256_v13 = vpop.permute.xlu1 %1255  ;;  %v1283_v15 = vmul.f32 %v1279_v12, %v1267_v47 }
 0xd13   :  { %v2073_v37 = vpop.eup %2072  ;;  %v1265_v31 = vadd.f32 %v1256_v13, %v1241_v11 }
 0xd14   :  { %v1280_v35 = vadd.f32 1.0, %v2073_v37 }
 0xd15   :  { %v1273_v62 = vmul.f32 0.70710677, %v1265_v31  ;;  %v1269_v61 = vmul.f32 0.5, %v1265_v31 }
 0xd16   :  { %v1284_v6 = vmul.f32 %v1280_v35, %v1268_v14  ;;  %v1261_v49 = vpop.permute.xlu1 %1260 }
 0xd17   :  { %2074 = verf.f32 %v1273_v62  ;;  %v1266_v55 = vadd.f32 %v1261_v49, %v1242_v4 }
 0xd18   :  { %v1287_v38 = vpack.c.bf16 %v1284_v6, %v1283_v15 }
 0xd19   :  { %v1274_v9 = vmul.f32 0.70710677, %v1266_v55  ;;  %v1270_v18 = vmul.f32 0.5, %v1266_v55 }
 0xd1a   :  { %1897 = vmatprep.subr.bf16.mxu0 %v1287_v38 }
 0xd1b   :  { %2076 = verf.f32 %v1274_v9  ;;  %1898 = vmatpush3.bf16.msra.mxu0 %v1287_v38 }
 0xd21   :  { %v2075_v44 = vpop.eup %2074 }
 0xd22   :  { %v1281_v50 = vadd.f32 1.0, %v2075_v44 }
 0xd24   :  { %v1285_v10 = vmul.f32 %v1281_v50, %v1269_v61 }
 0xd25   :  { %v2077_v40 = vpop.eup %2076 }
 0xd26   :  { %v1282_v41 = vadd.f32 1.0, %v2077_v40 }
 0xd28   :  { %v1286_v54 = vmul.f32 %v1282_v41, %v1270_v18 }
 0xd2a   :  { %v1288_v28 = vpack.c.bf16 %v1286_v54, %v1285_v10 }
 0xd2c   :  { %1899 = vmatprep.subr.bf16.mxu0 %v1288_v28 }
 0xd2d   :  { %1900 = vmatpush3.bf16.msra.mxu0 %v1288_v28 }
 0xd30   :  { %1902 = vmatmul.mubr.msk.bf16.vlgmr.msra.gmra.mrb[12].mxu0 %vm273_vm2, %v1979_v43 }
 0xe03   :  { %v2763_v27 = vpop.f32.mrb[12].mxu0 }
 0xe04   :  { %v2765_v59 = vpop.f32.mrb[13].mxu0  ;;  %v1360_v32 = vsel %vm116_vm1, %v2763_v27, 0.0  ;;  %v1368_v23 = vmul.f32 %v2763_v27, %v2763_v27 }
 0xe05   :  { %1361 = vadd.xlane.f32.xlu1 %v1360_v32  ;;  %v2769_v51 = vpop.f32.mrb[14].mxu0  ;;  %v1366_v0 = vmul.f32 %v2765_v59, %v2765_v59  ;;  %v1354_v17 = vsel %vm116_vm1, %v2765_v59, 0.0 }
 0xe06   :  { %v2771_v56 = vpop.f32.mrb[15].mxu0  ;;  %v1363_v20 = vsel %vm116_vm1, %v2769_v51, 0.0  ;;  %v1369_v52 = vmul.f32 %v2769_v51, %v2769_v51  ;;  %v1376_v16 = vsel %vm116_vm1, %v1368_v23, 0.0 }
 0xe07   :  { %1364 = vadd.xlane.f32.xlu0 %v1363_v20  ;;  %v1357_v7 = vsel %vm116_vm1, %v2771_v56, 0.0  ;;  %v1367_v3 = vmul.f32 %v2771_v56, %v2771_v56  ;;  %v1370_v46 = vsel %vm116_vm1, %v1366_v0, 0.0 }
 0xe08   :  { %v1379_v34 = vsel %vm116_vm1, %v1369_v52, 0.0 }
 0xe09   :  { %1355 = vadd.xlane.f32.xlu1 %v1354_v17  ;;  %v1373_v29 = vsel %vm116_vm1, %v1367_v3, 0.0 }
 0xe0b   :  { %1358 = vadd.xlane.f32.xlu0 %v1357_v7 }
 0xe0d   :  { %1371 = vadd.xlane.f32.xlu1 %v1370_v46 }
 0xe0f   :  { %1374 = vadd.xlane.f32.xlu0 %v1373_v29 }
 0xe11   :  { %1377 = vadd.xlane.f32.xlu1 %v1376_v16 }
 0xe13   :  { %1380 = vadd.xlane.f32.xlu0 %v1379_v34 }
 0xe92   :  { %v1362_v36 = vpop.xlane.xlu1 %1361 }
 0xe93   :  { %v2791_v1 = vmul.f32 0.125, %v1362_v36 }
 0xe94   :  { %v1365_v39 = vpop.xlane.xlu0 %1364 }
 0xe95   :  { %v2793_v2 = vmul.f32 0.125, %v1365_v39  ;;  %v1416_v48 = vsub.f32 %v2763_v27, %v2791_v1  ;;  %v1392_v38 = vmul.f32 %v2791_v1, %v2791_v1 }
 0xe96   :  { %v1356_v33 = vpop.xlane.xlu1 %1355 }
 0xe97   :  { %v1382_v53 = vmul.f32 0.125, %v1356_v33  ;;  %v1417_v57 = vsub.f32 %v2769_v51, %v2793_v2  ;;  %v1393_v18 = vmul.f32 %v2793_v2, %v2793_v2 }
 0xe98   :  { %v1359_v60 = vpop.xlane.xlu0 %1358 }
 0xe99   :  { %v1383_v63 = vmul.f32 0.125, %v1359_v60  ;;  %v1414_v11 = vsub.f32 %v2765_v59, %v1382_v53  ;;  %v1390_v13 = vmul.f32 %v1382_v53, %v1382_v53 }
 0xe9a   :  { %v1372_v12 = vpop.xlane.xlu1 %1371 }
 0xe9b   :  { %v1386_v37 = vmul.f32 0.125, %v1372_v12  ;;  %v1415_v31 = vsub.f32 %v2771_v56, %v1383_v63  ;;  %v1391_v14 = vmul.f32 %v1383_v63, %v1383_v63 }
 0xe9c   :  { %v1375_v47 = vpop.xlane.xlu0 %1374 }
 0xe9d   :  { %v1394_v35 = vsub.f32 %v1386_v37, %v1390_v13  ;;  %v1387_v4 = vmul.f32 0.125, %v1375_v47 }
 0xe9e   :  { %v1378_v62 = vpop.xlane.xlu1 %1377 }
 0xe9f   :  { %v1398_v15 = vmax.f32 %v1394_v35, 0.0  ;;  %v1395_v6 = vsub.f32 %v1387_v4, %v1391_v14  ;;  %v1388_v49 = vmul.f32 0.125, %v1378_v62 }
 0xea0   :  { %v1381_v55 = vpop.xlane.xlu0 %1380 }
 0xea1   :  { %v1402_v9 = vadd.f32 1e-05, %v1398_v15  ;;  %v1399_v44 = vmax.f32 %v1395_v6, 0.0  ;;  %v1396_v40 = vsub.f32 %v1388_v49, %v1392_v38  ;;  %v1389_v61 = vmul.f32 0.125, %v1381_v55 }
 0xea3   :  { %2078 = vrsqrt.f32 %v1402_v9  ;;  %v1403_v50 = vadd.f32 1e-05, %v1399_v44  ;;  %v1400_v41 = vmax.f32 %v1396_v40, 0.0  ;;  %v1397_v10 = vsub.f32 %v1389_v61, %v1393_v18  ;;  %v1981_v44 = vld [vmem:[%s2938_s6 + $0x8] sm:$0xff]  }
 0xea5   :  { %2080 = vrsqrt.f32 %v1403_v50  ;;  %v1404_v54 = vadd.f32 1e-05, %v1400_v41  ;;  %v1401_v28 = vmax.f32 %v1397_v10, 0.0 }
 0xea7   :  { %2082 = vrsqrt.f32 %v1404_v54  ;;  %v1405_v56 = vadd.f32 1e-05, %v1401_v28 }
 0xea9   :  { %2084 = vrsqrt.f32 %v1405_v56 }
 0xead   :  { %v2079_v43 = vpop.eup %2078 }
 0xeae   :  { %v1410_v59 = vmul.f32 %v2079_v43, %v2716_v30 }
 0xeaf   :  { %v2081_v32 = vpop.eup %2080 }
 0xeb0   :  { %1420 = vperm.xlu1 %1956, %v1410_v59   ;;  %v1411_v20 = vmul.f32 %v2081_v32, %v2722_v22 }
 0xeb1   :  { %v2083_v0 = vpop.eup %2082 }
 0xeb2   :  { %1425 = vperm.xlu0 %1957, %v1411_v20   ;;  %v1412_v17 = vmul.f32 %v2083_v0, %v2732_v45 }
 0xeb3   :  { %v2085_v7 = vpop.eup %2084 }
 0xeb4   :  { %1958 = vset.pattern.permute.xlu1 %v2137_v42  ;;  %v1413_v3 = vmul.f32 %v2085_v7, %v2739_v25  ;;  %v1557_v7 = vld [vmem:[%s2939_s7] sm:$0xff] }
 0xeb5   :  { %1443 = vperm.xlu1 %1958, %v2716_v30   ;;  %v1980_v30 = vld [vmem:[%s2938_s6] sm:$0xff]  }
 0xeb6   :  { %1961 = vset.pattern.permute.xlu0 %v2135_v24  ;;  %1909 = vmatprep.mubr.msk.bf16.mxu1 %vm273_vm2, %v1980_v30 }
 0xeb9   :  { %1447 = vperm.xlu1 %1958, %v2722_v22  }
 0xebd   :  { %1959 = vset.pattern.permute.xlu1 %v2136_v58 }
 0xebe   :  { %1430 = vperm.xlu1 %1959, %v1412_v17  }
 0xec2   :  { %1435 = vperm.xlu1 %1959, %v1413_v3   ;;  %v1558_v3 = vld [vmem:[%s2939_s7 + $0x8] sm:$0xff] }
 0xec6   :  { %1960 = vset.pattern.permute.xlu1 %v2137_v42 }
 0xec7   :  { %1451 = vperm.xlu1 %1960, %v2732_v45  }
 0xecb   :  { %1455 = vperm.xlu1 %1960, %v2739_v25  }
 0xecf   :  { %1962 = vset.pattern.permute.xlu1 %v2134_v21 }
 0xf2f   :  { %v1421_v22 = vpop.permute.xlu1 %1420 }
 0xf30   :  { %v1438_v58 = vmul.f32 %v1421_v22, %v1414_v11 }
 0xf31   :  { %v1426_v23 = vpop.permute.xlu0 %1425 }
 0xf32   :  { %v1439_v52 = vmul.f32 %v1426_v23, %v1415_v31 }
 0xf34   :  { %v1444_v46 = vpop.permute.xlu1 %1443 }
 0xf35   :  { %v1458_v29 = vadd.f32 %v1444_v46, %v1438_v58 }
 0xf37   :  { %v1462_v42 = vadd.f32 %v1458_v29, %v2645_v26 }
 0xf38   :  { %v1448_v16 = vpop.permute.xlu1 %1447 }
 0xf39   :  { %v1470_v45 = vmul.f32 0.70710677, %v1462_v42  ;;  %v1459_v34 = vadd.f32 %v1448_v16, %v1439_v52 }
 0xf3b   :  { %2086 = verf.f32 %v1470_v45  ;;  %v1463_v25 = vadd.f32 %v1459_v34, %v2647_v5  ;;  %v1466_v5 = vmul.f32 0.5, %v1462_v42 }
 0xf3d   :  { %v1471_v36 = vmul.f32 0.70710677, %v1463_v25  ;;  %v1431_v39 = vpop.permute.xlu1 %1430  ;;  %v1467_v31 = vmul.f32 0.5, %v1463_v25 }
 0xf3e   :  { %v1440_v60 = vmul.f32 %v1431_v39, %v1416_v48 }
 0xf3f   :  { %2088 = verf.f32 %v1471_v36 }
 0xf41   :  { %v1436_v33 = vpop.permute.xlu1 %1435 }
 0xf42   :  { %v1441_v26 = vmul.f32 %v1436_v33, %v1417_v57 }
 0xf45   :  { %v2087_v53 = vpop.eup %2086 }
 0xf46   :  { %v1452_v63 = vpop.permute.xlu1 %1451  ;;  %v1478_v12 = vadd.f32 1.0, %v2087_v53 }
 0xf47   :  { %v1460_v11 = vadd.f32 %v1452_v63, %v1440_v60 }
 0xf48   :  { %v1482_v62 = vmul.f32 %v1478_v12, %v1466_v5 }
 0xf49   :  { %v2089_v13 = vpop.eup %2088  ;;  %v1464_v37 = vadd.f32 %v1460_v11, %v2651_v19 }
 0xf4a   :  { %v1479_v47 = vadd.f32 1.0, %v2089_v13  ;;  %v1456_v14 = vpop.permute.xlu1 %1455 }
 0xf4b   :  { %v1472_v35 = vmul.f32 0.70710677, %v1464_v37  ;;  %v1461_v4 = vadd.f32 %v1456_v14, %v1441_v26  ;;  %v1468_v19 = vmul.f32 0.5, %v1464_v37 }
 0xf4c   :  { %v1483_v15 = vmul.f32 %v1479_v47, %v1467_v31 }
 0xf4d   :  { %2090 = verf.f32 %v1472_v35  ;;  %v1465_v27 = vadd.f32 %v1461_v4, %v2653_v8 }
 0xf4e   :  { %v1490_v1 = vpack.c.bf16 %v1483_v15, %v1482_v62 }
 0xf4f   :  { %v1473_v48 = vmul.f32 0.70710677, %v1465_v27  ;;  %v1469_v6 = vmul.f32 0.5, %v1465_v27 }
 0xf50   :  { %1905 = vmatprep.subr.bf16.mxu1 %v1490_v1 }
 0xf51   :  { %2092 = verf.f32 %v1473_v48  ;;  %1906 = vmatpush3.bf16.msra.mxu1 %v1490_v1 }
 0xf57   :  { %v2091_v51 = vpop.eup %2090 }
 0xf58   :  { %v1480_v2 = vadd.f32 1.0, %v2091_v51 }
 0xf5a   :  { %v1484_v55 = vmul.f32 %v1480_v2, %v1468_v19 }
 0xf5b   :  { %v2093_v57 = vpop.eup %2092 }
 0xf5c   :  { %v1481_v49 = vadd.f32 1.0, %v2093_v57 }
 0xf5e   :  { %v1485_v38 = vmul.f32 %v1481_v49, %v1469_v6  ;;  %v1559_v6 = vld [vmem:[%s2939_s7 + $0x10] sm:$0xff] }
 0xf60   :  { %v1491_v9 = vpack.c.bf16 %v1485_v38, %v1484_v55 }
 0xf62   :  { %1907 = vmatprep.subr.bf16.mxu1 %v1491_v9 }
 0xf63   :  { %1908 = vmatpush3.bf16.msra.mxu1 %v1491_v9  ;;  %v1560_v9 = vld [vmem:[%s2939_s7 + $0x18] sm:$0xff] }
 0xf66   :  { %1910 = vmatmul.mubr.msk.bf16.vlgmr.msra.gmra.mrb[12].mxu1 %vm273_vm2, %v1981_v44 }
0x1039   :  { %v2836_v8 = vpop.f32.mrb[12].mxu1 }
0x103a   :  { %v2838_v50 = vpop.f32.mrb[13].mxu1  ;;  %v1567_v40 = vsel %vm116_vm1, %v2836_v8, 0.0  ;;  %v1575_v32 = vmul.f32 %v2836_v8, %v2836_v8 }
0x103b   :  { %1568 = vadd.xlane.f32.xlu0 %v1567_v40  ;;  %v2842_v61 = vpop.f32.mrb[14].mxu1  ;;  %v1561_v18 = vsel %vm116_vm1, %v2838_v50, 0.0  ;;  %v1573_v54 = vmul.f32 %v2838_v50, %v2838_v50 }
0x103c   :  { %1562 = vadd.xlane.f32.xlu1 %v1561_v18  ;;  %v2846_v41 = vpop.f32.mrb[15].mxu1  ;;  %v1570_v43 = vsel %vm116_vm1, %v2842_v61, 0.0  ;;  %v1576_v56 = vmul.f32 %v2842_v61, %v2842_v61  ;;  %v1583_v0 = vsel %vm116_vm1, %v1575_v32, 0.0  ;;  %v2138_v18 = vmov 0.0  }
0x103d   :  { %v1564_v10 = vsel %vm116_vm1, %v2846_v41, 0.0  ;;  %v1574_v28 = vmul.f32 %v2846_v41, %v2846_v41  ;;  %v1577_v59 = vsel %vm116_vm1, %v1573_v54, 0.0  ;;  %1913 = vmatprep.subr.bf16.mxu0 %v2138_v18  ;;  %1917 = vmatprep.mubr.msk.bf16.mxu0 %vm2139_vm3, %v2138_v18 }
0x103e   :  { %v1586_v17 = vsel %vm116_vm1, %v1576_v56, 0.0 }
0x103f   :  { %1565 = vadd.xlane.f32.xlu0 %v1564_v10  ;;  %v1580_v20 = vsel %vm116_vm1, %v1574_v28, 0.0  ;;  %v1696_v10 = vld [vmem:[%s2941_s9] sm:$0xff] }
0x1040   :  { %1571 = vadd.xlane.f32.xlu1 %v1570_v43 }
0x1043   :  { %1578 = vadd.xlane.f32.xlu0 %v1577_v59 }
0x1044   :  { %1581 = vadd.xlane.f32.xlu1 %v1580_v20 }
0x1047   :  { %1584 = vadd.xlane.f32.xlu0 %v1583_v0 }
0x1048   :  { %1587 = vadd.xlane.f32.xlu1 %v1586_v17 }
0x1059   :  { %1651 = vperm.xlu1 %1962, %v1557_v7  }
0x105d   :  { %1656 = vperm.xlu1 %1962, %v1558_v3  }
0x1061   :  { %1963 = vset.pattern.permute.xlu1 %v2135_v24 }
0x10c8   :  { %v1569_v30 = vpop.xlane.xlu0 %1568 }
0x10c9   :  { %v2871_v22 = vmul.f32 0.125, %v1569_v30  ;;  %v1563_v58 = vpop.xlane.xlu1 %1562 }
0x10ca   :  { %v2873_v23 = vmul.f32 0.125, %v1563_v58 }
0x10cb   :  { %v1623_v46 = vsub.f32 %v2836_v8, %v2871_v22  ;;  %v1599_v12 = vmul.f32 %v2871_v22, %v2871_v22 }
0x10cc   :  { %v1566_v29 = vpop.xlane.xlu0 %1565  ;;  %v1621_v52 = vsub.f32 %v2838_v50, %v2873_v23  ;;  %v1597_v39 = vmul.f32 %v2873_v23, %v2873_v23 }
0x10cd   :  { %v2879_v42 = vmul.f32 0.125, %v1566_v29  ;;  %v1572_v16 = vpop.xlane.xlu1 %1571 }
0x10ce   :  { %v2881_v45 = vmul.f32 0.125, %v1572_v16 }
0x10cf   :  { %v1622_v34 = vsub.f32 %v2846_v41, %v2879_v42  ;;  %v1598_v13 = vmul.f32 %v2879_v42, %v2879_v42 }
0x10d0   :  { %v1579_v25 = vpop.xlane.xlu0 %1578  ;;  %v1624_v36 = vsub.f32 %v2842_v61, %v2881_v45  ;;  %v1600_v31 = vmul.f32 %v2881_v45, %v2881_v45 }
0x10d1   :  { %v1593_v33 = vmul.f32 0.125, %v1579_v25  ;;  %v1582_v53 = vpop.xlane.xlu1 %1581 }
0x10d2   :  { %v1594_v63 = vmul.f32 0.125, %v1582_v53 }
0x10d3   :  { %v1601_v60 = vsub.f32 %v1593_v33, %v1597_v39 }
0x10d4   :  { %v1585_v11 = vpop.xlane.xlu0 %1584  ;;  %v1602_v35 = vsub.f32 %v1594_v63, %v1598_v13 }
0x10d5   :  { %v1605_v26 = vmax.f32 %v1601_v60, 0.0  ;;  %v1595_v37 = vmul.f32 0.125, %v1585_v11  ;;  %v1588_v5 = vpop.xlane.xlu1 %1587 }
0x10d6   :  { %v1596_v47 = vmul.f32 0.125, %v1588_v5  ;;  %v1606_v1 = vmax.f32 %v1602_v35, 0.0 }
0x10d7   :  { %v1609_v14 = vadd.f32 1e-05, %v1605_v26  ;;  %v1603_v4 = vsub.f32 %v1595_v37, %v1599_v12  ;;  %v1693_v37 = vld [vmem:[%s2940_s8] sm:$0xf] }
0x10d8   :  { %v1604_v62 = vsub.f32 %v1596_v47, %v1600_v31  ;;  %v1610_v2 = vadd.f32 1e-05, %v1606_v1 }
0x10d9   :  { %2094 = vrsqrt.f32 %v1609_v14  ;;  %v1607_v15 = vmax.f32 %v1603_v4, 0.0  ;;  %v1652_v54 = vpop.permute.xlu1 %1651 }
0x10da   :  { %v1608_v27 = vmax.f32 %v1604_v62, 0.0 }
0x10db   :  { %v1611_v48 = vadd.f32 1e-05, %v1607_v15 }
0x10dc   :  { %v1612_v51 = vadd.f32 1e-05, %v1608_v27 }
0x10dd   :  { %2096 = vrsqrt.f32 %v1611_v48  ;;  %v1657_v28 = vpop.permute.xlu1 %1656 }
0x10de   :  { %2098 = vrsqrt.f32 %v1612_v51 }
0x10df   :  { %2100 = vrsqrt.f32 %v1610_v2 }
0x10e3   :  { %v2095_v57 = vpop.eup %2094 }
0x10e4   :  { %v1617_v19 = vmul.f32 %v2095_v57, %v1557_v7 }
0x10e6   :  { %1627 = vperm.xlu0 %1961, %v1617_v19  }
0x10e7   :  { %v2097_v49 = vpop.eup %2096 }
0x10e8   :  { %v1619_v55 = vmul.f32 %v2097_v49, %v1559_v6  ;;  %v2099_v38 = vpop.eup %2098 }
0x10e9   :  { %v1620_v44 = vmul.f32 %v2099_v38, %v1560_v9  ;;  %v2101_v50 = vpop.eup %2100 }
0x10ea   :  { %1637 = vperm.xlu1 %1963, %v1619_v55   ;;  %v1618_v40 = vmul.f32 %v2101_v50, %v1558_v3 }
0x10ee   :  { %1642 = vperm.xlu1 %1963, %v1620_v44  }
0x10f2   :  { %1632 = vperm.xlu1 %1963, %v1618_v40  }
0x10f6   :  { %1964 = vset.pattern.permute.xlu1 %v2134_v21 }
0x10f7   :  { %1661 = vperm.xlu1 %1964, %v1559_v6  }
0x10fb   :  { %1666 = vperm.xlu1 %1964, %v1560_v9  }
0x10ff   :  { %1965 = vset.pattern.permute.xlu1 %v2135_v24 }
0x1100   :  { %1699 = vperm.xlu1 %1965, %v1696_v10  }
0x1165   :  { %v1628_v43 = vpop.permute.xlu0 %1627 }
0x1166   :  { %v1645_v59 = vmul.f32 %v1628_v43, %v1621_v52 }
0x1168   :  { %v1669_v56 = vadd.f32 %v1652_v54, %v1645_v59 }
0x1169   :  { %v1638_v32 = vpop.permute.xlu1 %1637 }
0x116a   :  { %v1677_v20 = vmul.f32 0.70710677, %v1669_v56  ;;  %v1647_v7 = vmul.f32 %v1638_v32, %v1623_v46  ;;  %v1673_v39 = vmul.f32 0.5, %v1669_v56 }
0x116c   :  { %2102 = verf.f32 %v1677_v20 }
0x116d   :  { %v1643_v21 = vpop.permute.xlu1 %1642 }
0x116e   :  { %v1648_v23 = vmul.f32 %v1643_v21, %v1624_v36 }
0x1171   :  { %v1633_v0 = vpop.permute.xlu1 %1632 }
0x1172   :  { %v1646_v24 = vmul.f32 %v1633_v0, %v1622_v34 }
0x1174   :  { %v1670_v17 = vadd.f32 %v1657_v28, %v1646_v24 }
0x1176   :  { %v1678_v3 = vmul.f32 0.70710677, %v1670_v17  ;;  %v1662_v30 = vpop.permute.xlu1 %1661  ;;  %v2103_v42 = vpop.eup %2102  ;;  %v1674_v8 = vmul.f32 0.5, %v1670_v17 }
0x1177   :  { %v1671_v58 = vadd.f32 %v1662_v30, %v1647_v7  ;;  %v1685_v34 = vadd.f32 1.0, %v2103_v42 }
0x1178   :  { %2104 = verf.f32 %v1678_v3 }
0x1179   :  { %v1679_v29 = vmul.f32 0.70710677, %v1671_v58  ;;  %v1689_v33 = vmul.f32 %v1685_v34, %v1673_v39  ;;  %v1675_v61 = vmul.f32 0.5, %v1671_v58 }
0x117a   :  { %v1667_v52 = vpop.permute.xlu1 %1666 }
0x117b   :  { %2106 = verf.f32 %v1679_v29  ;;  %v1672_v16 = vadd.f32 %v1667_v52, %v1648_v23 }
0x117d   :  { %v1680_v41 = vmul.f32 0.70710677, %v1672_v16  ;;  %v1676_v45 = vmul.f32 0.5, %v1672_v16 }
0x117f   :  { %2108 = verf.f32 %v1680_v41  ;;  %v1700_v5 = vpop.permute.xlu1 %1699 }
0x1182   :  { %v2105_v25 = vpop.eup %2104 }
0x1183   :  { %v1686_v22 = vadd.f32 1.0, %v2105_v25 }
0x1185   :  { %v2107_v46 = vpop.eup %2106  ;;  %v1690_v53 = vmul.f32 %v1686_v22, %v1674_v8 }
0x1186   :  { %v1687_v63 = vadd.f32 1.0, %v2107_v46 }
0x1187   :  { %v1694_v60 = vpack.c.bf16 %v1690_v53, %v1689_v33 }
0x1188   :  { %v1691_v12 = vmul.f32 %v1687_v63, %v1675_v61 }
0x1189   :  { %v2109_v11 = vpop.eup %2108  ;;  %1914 = vmatpush3.bf16.msra.mxu0 %v1694_v60 }
0x118a   :  { %v1688_v36 = vadd.f32 1.0, %v2109_v11  ;;  %1915 = vmatprep.subr.bf16.mxu0 %v2138_v18 }
0x118c   :  { %v1692_v13 = vmul.f32 %v1688_v36, %v1676_v45 }
0x118e   :  { %v1695_v26 = vpack.c.bf16 %v1692_v13, %v1691_v12 }
0x1190   :  { %1916 = vmatpush3.bf16.msra.mxu0 %v1695_v26 }
0x1193   :  { %1918 = vmatmul.mubr.msk.bf16.vlgmr.msra.gmra.mrb[16].mxu0 %vm273_vm2, %v1693_v37 }
0x1266   :  { %v1739_v31 = vpop.f32.mrb[16].mxu0 }
0x1267   :  { %v1740_v47 = vadd.f32 %v1739_v31, %v1700_v5  ;;  %v1919_v14 = vpop.f32.mrb[17].mxu0 }
0x1268   :  { %v1742_v35 = vpop.f32.mrb[18].mxu0 }
0x1269   :  { %1745 = vst.msk [vmem:[#allocation2] sm:$0xff] %vm116_vm1, %v1740_v47  ;;  %v1920_v4 = vpop.f32.mrb[19].mxu0 }
0x126a   :  { %2121 = shalt.err (!%p2118_p4)
}
0x126b   :  { %s2122_s0 = scalar_lea.hbm %s2942_s10, 128 }
0x126c   :  { %p2123_p5 = scmp.ne.s32.totalorder %s2942_s10, %s2122_s0  ;;  %p2126_p6 = scmp.lt.u32.totalorder %s2122_s0, %s2942_s10 }
0x126e   :  { %p2128_p7 = pnand %p2126_p6, %p2123_p5 }
0x1270   :  { %2131 = shalt.err (!%p2128_p7)
}
0x1271   :  { %1755 = dma.vmem_to_hbm [thread:$0]  %s1753_s3, 128, %s2942_s10, [#allocation3]  }
0x1272   :  { %2132 = dma.done.wait [#allocation3], 128  }
0x1273   :  { %2133 = vsyncadd [#allocation3], 4294967168 }
0x1274   :  { %1759 = vsyncpa [#allocation3], 1 }

</bundles_post_ra>
